<compile_context>
chip_gen: v7x
topology: tpu7x:2x2x1
jax: 0.10.0
libtpu: 0.0.40
codegen_flags: <defaults>
</compile_context>

<pallas_src>
import functools

import jax
import jax.numpy as jnp
from jax.experimental import pallas as pl
from jax.experimental.pallas import tpu as pltpu


# ----------------------------------------------------------------------------
# Fused Pallas kernel: whole MSTGCN, everything resident in VMEM (gridless)
# ----------------------------------------------------------------------------

def _fused_decoder_kernel(*refs, depth, K):
    """Ref layout (all f32):

      refs[0]  X        (N, T*C0)      input features, (t, c) flattened on lanes
      refs[1]  cheb     (K, N, N)      Chebyshev polynomials T_k
      per block (4 refs each):
        theta_bd (K, T*Cin, T*Fc)   stack_k kron(I_T, theta_k)
        w_time   (T*Fc,  T*Ft)      sum_j kron(shift_j, tw_j)   ((1,3) conv)
        r_bd     (T*Cin, T*Ft)      kron(I_T, rw)               (1x1 residual)
        vecs     (3, T*Ft)          [time_bias + res_bias, gamma, beta], tiled
      then:
        ln_avg   (T*Ft, T*Ft)       kron(I_T, ones(Ft,Ft)/Ft)   (chunk mean)
        final_w  (T*Ft, P*Od)
        final_b  (1, P*Od)
      refs[-1] o_ref    (N, P*Od)
    """
    x_ref, cheb_ref = refs[0], refs[1]
    idx = 2
    blocks = []
    for _ in range(depth):
        blocks.append(refs[idx:idx + 4])
        idx += 4
    ln_ref, fw_ref, fb_ref = refs[idx], refs[idx + 1], refs[idx + 2]
    o_ref = refs[idx + 3]

    def dot(a, b):
        return jnp.dot(a, b, preferred_element_type=jnp.float32)

    X = x_ref[...]                          # (N, T*C) lane-dense working tensor
    ln_avg = ln_ref[...]                    # (T*Ft, T*Ft)
    cheb = [cheb_ref[k] for k in range(K)]  # K static, each (N, N)

    for theta_ref, wt_ref, rbd_ref, vec_ref in blocks:
        # --- Chebyshev graph conv: relu(sum_k T_k X Theta_k), all t at once.
        # Per-k accumulation with static slices -> aligned MXU contractions,
        # no lane-axis concat. (T_k symmetric, so T_k @ X matches the ref.)
        sp = dot(dot(cheb[0], X), theta_ref[0])
        for k in range(1, K):
            sp = sp + dot(dot(cheb[k], X), theta_ref[k])
        sp = jnp.maximum(sp, 0.0)

        # --- (1,3) temporal conv + 1x1 residual conv + fused biases, ReLU
        vec = vec_ref[...]                  # (3, T*Ft): [bias, gamma, beta]
        z = dot(sp, wt_ref[...]) + dot(X, rbd_ref[...]) + vec[0:1]
        z = jnp.maximum(z, 0.0)

        # --- LayerNorm over the Ft-sized channel chunks (eps = 1e-5); chunk
        # mean/var via block-diagonal averaging matmul (stays lane-dense).
        mean = dot(z, ln_avg)
        dz = z - mean
        var = dot(dz * dz, ln_avg)
        X = dz * (jax.lax.rsqrt(var + 1e-5) * vec[1:2]) + vec[2:3]

    # --- final (1, nb_time_filter) conv == dense over the flattened (t, f) lanes
    o_ref[...] = dot(X, fw_ref[...]) + fb_ref[...]


# ----------------------------------------------------------------------------
# Graph preprocessing (one-time, outside the per-call path)
# ----------------------------------------------------------------------------

def build_cheb_polynomials(edge_index, num_nodes, K):
    """Chebyshev polynomials T_0..T_{K-1} of the scaled normalized Laplacian."""
    src, dst = edge_index[0], edge_index[1]
    A = jnp.zeros((num_nodes, num_nodes), jnp.float32)
    A = A.at[src, dst].set(1.0)
    A = jnp.maximum(A, A.T)                                   # symmetrize
    deg = A.sum(axis=-1)
    d_inv_sqrt = jnp.where(deg > 0, 1.0 / jnp.sqrt(jnp.maximum(deg, 1e-12)), 0.0)
    eye = jnp.eye(num_nodes, dtype=jnp.float32)
    L = eye - d_inv_sqrt[:, None] * A * d_inv_sqrt[None, :]
    L_tilde = L - eye                                          # 2L/lambda_max - I
    polys = [eye, L_tilde]
    for _ in range(2, K):
        polys.append(2.0 * L_tilde @ polys[-1] - polys[-2])
    return jnp.stack(polys[:K], axis=0)


# ----------------------------------------------------------------------------
# Decoder wrapper
# ----------------------------------------------------------------------------

class EdgePoolDecoderPallas:
    def __init__(self, dim, depth, K, nb_chev_filter, nb_time_filter,
                 num_time_steps, len_input, time_strides=1,
                 propagate_pair_attention=None, output_dim=3):
        assert time_strides == 1, "synthetic config uses time_strides=1"
        self.dim = dim
        self.depth = depth
        self.K = K
        self.Fc = nb_chev_filter
        self.Ft = nb_time_filter
        self.num_time_steps = num_time_steps
        self.len_input = len_input
        self.output_dim = output_dim
        self.propagate_pair_attention = propagate_pair_attention

    # ------------------------------------------------------------------ params
    def init_params(self, key):
        params = {"blocks": []}
        in_ch = self.dim
        for _ in range(self.depth):
            key, k1, k2, k3 = jax.random.split(key, 4)
            blk = {
                "theta": 0.1 * jax.random.normal(k1, (self.K, in_ch, self.Fc), jnp.float32),
                "tw":    0.1 * jax.random.normal(k2, (3, self.Fc, self.Ft), jnp.float32),
                "tb":    jnp.zeros((1, self.Ft), jnp.float32),
                "rw":    0.1 * jax.random.normal(k3, (in_ch, self.Ft), jnp.float32),
                "rb":    jnp.zeros((1, self.Ft), jnp.float32),
                "gamma": jnp.ones((1, self.Ft), jnp.float32),
                "beta":  jnp.zeros((1, self.Ft), jnp.float32),
            }
            params["blocks"].append(blk)
            in_ch = self.Ft
        key, kf = jax.random.split(key)
        out_ch = self.num_time_steps * self.output_dim
        params["final_w"] = 0.1 * jax.random.normal(
            kf, (self.len_input * self.Ft, out_ch), jnp.float32)
        params["final_b"] = jnp.zeros((1, out_ch), jnp.float32)
        return params

    def prepare(self, params, edge_index, num_nodes):
        """One-time weight folding + graph preprocessing (per graph/params)."""
        T, Ft, K = self.len_input, self.Ft, self.K
        f32 = jnp.float32
        eye_t = jnp.eye(T, dtype=f32)
        prepped = {
            "cheb": build_cheb_polynomials(edge_index, num_nodes, K),
            "blocks": [],
            # block-diagonal averaging matrix: per-time-chunk channel mean
            "ln_avg": jnp.kron(eye_t, jnp.full((Ft, Ft), 1.0 / Ft, f32)),
            "final_w": params["final_w"],
            "final_b": params["final_b"],
        }
        for blk in params["blocks"]:
            theta = blk["theta"]                                  # (K, Cin, Fc)
            theta_bd = jnp.stack(
                [jnp.kron(eye_t, theta[k]) for k in range(K)])    # (K, T*Cin, T*Fc)
            # zero-padded (1,3) temporal conv folded into one matrix:
            #   out[t] = sum_j sp[t + j - 1] @ tw[j]
            w_time = sum(jnp.kron(jnp.eye(T, k=1 - j, dtype=f32), blk["tw"][j])
                         for j in range(3))                       # (T*Fc, T*Ft)
            r_bd = jnp.kron(eye_t, blk["rw"])                     # (T*Cin, T*Ft)
            bias = jnp.tile(blk["tb"] + blk["rb"], (1, T))        # fused conv biases
            vecs = jnp.concatenate(
                [bias, jnp.tile(blk["gamma"], (1, T)), jnp.tile(blk["beta"], (1, T))],
                axis=0)                                           # (3, T*Ft)
            prepped["blocks"].append(
                {"theta_bd": theta_bd, "w_time": w_time, "r_bd": r_bd, "vecs": vecs})
        return prepped

    # ----------------------------------------------------------------- forward
    def _fused_call(self, X, prepped):
        N = X.shape[0]
        out_ch = self.num_time_steps * self.output_dim
        args = [X, prepped["cheb"]]
        for b in prepped["blocks"]:
            args += [b["theta_bd"], b["w_time"], b["r_bd"], b["vecs"]]
        args += [prepped["ln_avg"], prepped["final_w"], prepped["final_b"]]

        # Advisory cost hint for XLA scheduling around the custom call.
        flops = 0
        transcendentals = 0
        for b in prepped["blocks"]:
            kb, tcin, tfc = b["theta_bd"].shape
            tft = b["w_time"].shape[1]
            flops += 2 * kb * (N * N * tcin + N * tcin * tfc)    # cheb conv
            flops += 2 * N * (tfc + tcin) * tft                  # temporal + residual
            flops += 4 * N * tft * tft                           # LN stats matmuls
            transcendentals += N * tft                           # rsqrt
        flops += 2 * N * prepped["final_w"].shape[0] * out_ch
        bytes_accessed = sum(int(a.size) * a.dtype.itemsize for a in args)
        bytes_accessed += N * out_ch * 4
        cost = pl.CostEstimate(flops=int(flops),
                               transcendentals=int(transcendentals),
                               bytes_accessed=int(bytes_accessed))

        return pl.pallas_call(
            functools.partial(_fused_decoder_kernel, depth=self.depth, K=self.K),
            out_shape=jax.ShapeDtypeStruct((N, out_ch), jnp.float32),
            in_specs=[pl.BlockSpec(memory_space=pltpu.MemorySpace.VMEM)
                      for _ in args],
            out_specs=pl.BlockSpec(memory_space=pltpu.MemorySpace.VMEM),
            cost_estimate=cost,
        )(*args)

    def __call__(self, prepped, feats, input_coords, scores=None, pair_edge=None):
        # propagate_pair_attention is None -> GraphTransformer branch skipped;
        # scores / pair_edge unused by the forward (kept for signature parity).
        T = input_coords.shape[0]                  # num_history == len_input
        N, d = feats.shape
        assert T == self.len_input and d + input_coords.shape[-1] == self.dim

        # repeat(feats, 'n d -> t n d'); cat([feats, coords], -1); lane-dense (N, T*C)
        feats_rep = jnp.broadcast_to(feats[None], (T, N, d))
        x = jnp.concatenate([feats_rep, input_coords], axis=-1)        # (T, N, C)
        X = jnp.transpose(x, (1, 0, 2)).reshape(N, T * self.dim)       # (N, T*C)

        out = self._fused_call(X, prepped)                             # (N, P*Od)
        pred = out.reshape(N, self.num_time_steps, self.output_dim)
        pred = jnp.transpose(pred, (1, 0, 2))                          # (P, N, Od)
        return feats_rep, pred


# ----------------------------------------------------------------------------
# Pure-JAX reference of the unfolded math (guards the weight folding)
# ----------------------------------------------------------------------------

def reference_forward(params, cheb, feats, input_coords, num_time_steps, output_dim):
    T, N, _ = input_coords.shape
    d = feats.shape[1]
    K = cheb.shape[0]
    feats_rep = jnp.broadcast_to(feats[None], (T, N, d))
    x = jnp.concatenate([feats_rep, input_coords], axis=-1)            # (T, N, C)
    x = jnp.transpose(x, (1, 2, 0))                                    # (N, C, T)
    for blk in params["blocks"]:
        theta, tw = blk["theta"], blk["tw"]
        outs = []
        for t in range(T):
            gs = x[:, :, t]
            acc = jnp.zeros((N, theta.shape[-1]), jnp.float32)
            for k in range(K):
                acc = acc + (cheb[k] @ gs) @ theta[k]
            outs.append(acc)
        sp = jax.nn.relu(jnp.stack(outs, axis=-1))                     # (N, Fc, T)
        sp_pad = jnp.pad(sp, ((0, 0), (0, 0), (1, 1)))
        tc = sum(jnp.einsum('nct,cf->nft', sp_pad[:, :, j:j + T], tw[j])
                 for j in range(3)) + blk["tb"].reshape(1, -1, 1)
        res = jnp.einsum('nct,cf->nft', x, blk["rw"]) + blk["rb"].reshape(1, -1, 1)
        z = jax.nn.relu(tc + res)                                      # (N, Ft, T)
        zt = jnp.transpose(z, (0, 2, 1))                               # (N, T, Ft)
        mean = zt.mean(-1, keepdims=True)
        var = ((zt - mean) ** 2).mean(-1, keepdims=True)
        zt = ((zt - mean) * jax.lax.rsqrt(var + 1e-5)
              * blk["gamma"].reshape(1, 1, -1) + blk["beta"].reshape(1, 1, -1))
        x = jnp.transpose(zt, (0, 2, 1))                               # (N, Ft, T)
    xt = jnp.transpose(x, (0, 2, 1)).reshape(N, -1)                    # (N, T*Ft)
    out = xt @ params["final_w"] + params["final_b"]
    pred = jnp.transpose(out.reshape(N, num_time_steps, output_dim), (1, 0, 2))
    return feats_rep, pred


# ----------------------------------------------------------------------------
# Demo
# ----------------------------------------------------------------------------

if __name__ == "__main__":
    key = jax.random.PRNGKey(0)

    # small synthetic config
    N = 16                 # graph nodes
    d_feat = 13            # node feature dim
    coord_dim = 3
    dim = d_feat + coord_dim  # MSTGCN in_channels
    depth = 2
    K = 3
    nb_chev_filter = 16
    nb_time_filter = 16
    len_input = 8          # num_history
    num_time_steps = 4     # num_for_predict

    decoder = EdgePoolDecoderPallas(
        dim=dim, depth=depth, K=K,
        nb_chev_filter=nb_chev_filter, nb_time_filter=nb_time_filter,
        num_time_steps=num_time_steps, len_input=len_input,
        time_strides=1, propagate_pair_attention=None, output_dim=coord_dim)

    key, kp, kf, kc = jax.random.split(key, 4)
    params = decoder.init_params(kp)

    feats = jax.random.normal(kf, (N, d_feat), jnp.float32)
    input_coords = jax.random.normal(kc, (len_input, N, coord_dim), jnp.float32)

    # deterministic ring + chord graph
    nodes = jnp.arange(N)
    src = jnp.concatenate([nodes, nodes])
    dst = jnp.concatenate([(nodes + 1) % N, (nodes + 3) % N])
    edge_index = jnp.stack([src, dst], axis=0).astype(jnp.int32)

    # one-time graph / weight preprocessing (out of the per-call path)
    prepped = decoder.prepare(params, edge_index, N)

    @jax.jit
    def run(prepped, feats, input_coords):
        return decoder(prepped, feats, input_coords)

    feats_out, pred_coords = run(prepped, feats, input_coords)
    jax.block_until_ready((feats_out, pred_coords))

    assert feats_out.shape == (len_input, N, d_feat)
    assert pred_coords.shape == (num_time_steps, N, coord_dim)
    assert bool(jnp.all(jnp.isfinite(pred_coords)))

    # correctness guard: pure-JAX reference of the same (unfolded) math
    ref_feats, ref_pred = reference_forward(
        params, prepped["cheb"], feats, input_coords, num_time_steps, coord_dim)
    assert bool(jnp.all(feats_out == ref_feats))
    err = float(jnp.max(jnp.abs(pred_coords - ref_pred)))
    assert err < 2e-1, f"kernel/reference mismatch: {err}"

    print("KERNEL_OK")
</pallas_src>

<mosaic_0001>
module attributes {stable_mosaic.version = 11 : i64} {
  func.func @_fused_decoder_kernel(%arg0: memref<16x128xf32, #tpu.memory_space<vmem>>, %arg1: memref<3x16x16xf32, #tpu.memory_space<vmem>>, %arg2: memref<3x128x128xf32, #tpu.memory_space<vmem>>, %arg3: memref<128x128xf32, #tpu.memory_space<vmem>>, %arg4: memref<128x128xf32, #tpu.memory_space<vmem>>, %arg5: memref<3x128xf32, #tpu.memory_space<vmem>>, %arg6: memref<3x128x128xf32, #tpu.memory_space<vmem>>, %arg7: memref<128x128xf32, #tpu.memory_space<vmem>>, %arg8: memref<128x128xf32, #tpu.memory_space<vmem>>, %arg9: memref<3x128xf32, #tpu.memory_space<vmem>>, %arg10: memref<128x128xf32, #tpu.memory_space<vmem>>, %arg11: memref<128x12xf32, #tpu.memory_space<vmem>>, %arg12: memref<1x12xf32, #tpu.memory_space<vmem>>, %arg13: memref<16x12xf32, #tpu.memory_space<vmem>>) attributes {dimension_semantics = [], scalar_prefetch = 0 : i64, scratch_operands = 0 : i64, tpu.core_type = #tpu.core_type<tc>} {
    %c0 = arith.constant 0 : index
    %c0_0 = arith.constant 0 : index
    %0 = vector.load %arg0[%c0, %c0_0] : memref<16x128xf32, #tpu.memory_space<vmem>>, vector<16x128xf32>
    %c0_1 = arith.constant 0 : index
    %c0_2 = arith.constant 0 : index
    %1 = vector.load %arg10[%c0_1, %c0_2] : memref<128x128xf32, #tpu.memory_space<vmem>>, vector<128x128xf32>
    %c0_3 = arith.constant 0 : index
    %c0_4 = arith.constant 0 : index
    %c0_5 = arith.constant 0 : index
    %2 = vector.load %arg1[%c0_3, %c0_4, %c0_5] : memref<3x16x16xf32, #tpu.memory_space<vmem>>, vector<1x16x16xf32>
    %3 = vector.shape_cast %2 : vector<1x16x16xf32> to vector<16x16xf32>
    %c1 = arith.constant 1 : index
    %c0_6 = arith.constant 0 : index
    %c0_7 = arith.constant 0 : index
    %4 = vector.load %arg1[%c1, %c0_6, %c0_7] : memref<3x16x16xf32, #tpu.memory_space<vmem>>, vector<1x16x16xf32>
    %5 = vector.shape_cast %4 : vector<1x16x16xf32> to vector<16x16xf32>
    %c2 = arith.constant 2 : index
    %c0_8 = arith.constant 0 : index
    %c0_9 = arith.constant 0 : index
    %6 = vector.load %arg1[%c2, %c0_8, %c0_9] : memref<3x16x16xf32, #tpu.memory_space<vmem>>, vector<1x16x16xf32>
    %7 = vector.shape_cast %6 : vector<1x16x16xf32> to vector<16x16xf32>
    %cst = arith.constant dense<0.000000e+00> : vector<16x128xf32>
    %8 = tpu.matmul %3, %0, %cst {dimension_numbers = #tpu.dot_dimension_numbers<[1], [0], [0], [1], [0, 0, 1, 1], [], []>} : vector<16x16xf32>, vector<16x128xf32>, vector<16x128xf32> -> vector<16x128xf32>
    %c0_10 = arith.constant 0 : index
    %c0_11 = arith.constant 0 : index
    %c0_12 = arith.constant 0 : index
    %9 = vector.load %arg2[%c0_10, %c0_11, %c0_12] : memref<3x128x128xf32, #tpu.memory_space<vmem>>, vector<1x128x128xf32>
    %10 = vector.shape_cast %9 : vector<1x128x128xf32> to vector<128x128xf32>
    %cst_13 = arith.constant dense<0.000000e+00> : vector<16x128xf32>
    %11 = tpu.matmul %8, %10, %cst_13 {dimension_numbers = #tpu.dot_dimension_numbers<[1], [0], [0], [1], [0, 0, 1, 1], [], []>} : vector<16x128xf32>, vector<128x128xf32>, vector<16x128xf32> -> vector<16x128xf32>
    %cst_14 = arith.constant dense<0.000000e+00> : vector<16x128xf32>
    %12 = tpu.matmul %5, %0, %cst_14 {dimension_numbers = #tpu.dot_dimension_numbers<[1], [0], [0], [1], [0, 0, 1, 1], [], []>} : vector<16x16xf32>, vector<16x128xf32>, vector<16x128xf32> -> vector<16x128xf32>
    %c1_15 = arith.constant 1 : index
    %c0_16 = arith.constant 0 : index
    %c0_17 = arith.constant 0 : index
    %13 = vector.load %arg2[%c1_15, %c0_16, %c0_17] : memref<3x128x128xf32, #tpu.memory_space<vmem>>, vector<1x128x128xf32>
    %14 = vector.shape_cast %13 : vector<1x128x128xf32> to vector<128x128xf32>
    %cst_18 = arith.constant dense<0.000000e+00> : vector<16x128xf32>
    %15 = tpu.matmul %12, %14, %cst_18 {dimension_numbers = #tpu.dot_dimension_numbers<[1], [0], [0], [1], [0, 0, 1, 1], [], []>} : vector<16x128xf32>, vector<128x128xf32>, vector<16x128xf32> -> vector<16x128xf32>
    %16 = arith.addf %11, %15 : vector<16x128xf32>
    %cst_19 = arith.constant dense<0.000000e+00> : vector<16x128xf32>
    %17 = tpu.matmul %7, %0, %cst_19 {dimension_numbers = #tpu.dot_dimension_numbers<[1], [0], [0], [1], [0, 0, 1, 1], [], []>} : vector<16x16xf32>, vector<16x128xf32>, vector<16x128xf32> -> vector<16x128xf32>
    %c2_20 = arith.constant 2 : index
    %c0_21 = arith.constant 0 : index
    %c0_22 = arith.constant 0 : index
    %18 = vector.load %arg2[%c2_20, %c0_21, %c0_22] : memref<3x128x128xf32, #tpu.memory_space<vmem>>, vector<1x128x128xf32>
    %19 = vector.shape_cast %18 : vector<1x128x128xf32> to vector<128x128xf32>
    %cst_23 = arith.constant dense<0.000000e+00> : vector<16x128xf32>
    %20 = tpu.matmul %17, %19, %cst_23 {dimension_numbers = #tpu.dot_dimension_numbers<[1], [0], [0], [1], [0, 0, 1, 1], [], []>} : vector<16x128xf32>, vector<128x128xf32>, vector<16x128xf32> -> vector<16x128xf32>
    %21 = arith.addf %16, %20 : vector<16x128xf32>
    %cst_24 = arith.constant 0.000000e+00 : f32
    %22 = vector.broadcast %cst_24 : f32 to vector<16x128xf32>
    %23 = arith.maximumf %21, %22 : vector<16x128xf32>
    %c0_25 = arith.constant 0 : index
    %c0_26 = arith.constant 0 : index
    %24 = vector.load %arg5[%c0_25, %c0_26] : memref<3x128xf32, #tpu.memory_space<vmem>>, vector<3x128xf32>
    %c0_27 = arith.constant 0 : index
    %c0_28 = arith.constant 0 : index
    %25 = vector.load %arg3[%c0_27, %c0_28] : memref<128x128xf32, #tpu.memory_space<vmem>>, vector<128x128xf32>
    %cst_29 = arith.constant dense<0.000000e+00> : vector<16x128xf32>
    %26 = tpu.matmul %23, %25, %cst_29 {dimension_numbers = #tpu.dot_dimension_numbers<[1], [0], [0], [1], [0, 0, 1, 1], [], []>} : vector<16x128xf32>, vector<128x128xf32>, vector<16x128xf32> -> vector<16x128xf32>
    %c0_30 = arith.constant 0 : index
    %c0_31 = arith.constant 0 : index
    %27 = vector.load %arg4[%c0_30, %c0_31] : memref<128x128xf32, #tpu.memory_space<vmem>>, vector<128x128xf32>
    %cst_32 = arith.constant dense<0.000000e+00> : vector<16x128xf32>
    %28 = tpu.matmul %0, %27, %cst_32 {dimension_numbers = #tpu.dot_dimension_numbers<[1], [0], [0], [1], [0, 0, 1, 1], [], []>} : vector<16x128xf32>, vector<128x128xf32>, vector<16x128xf32> -> vector<16x128xf32>
    %29 = arith.addf %26, %28 : vector<16x128xf32>
    %30 = vector.extract_strided_slice %24 {offsets = [0, 0], sizes = [1, 128], strides = [1, 1]} : vector<3x128xf32> to vector<1x128xf32>
    %31 = vector.broadcast %30 : vector<1x128xf32> to vector<16x128xf32>
    %32 = arith.addf %29, %31 : vector<16x128xf32>
    %cst_33 = arith.constant 0.000000e+00 : f32
    %33 = vector.broadcast %cst_33 : f32 to vector<16x128xf32>
    %34 = arith.maximumf %32, %33 : vector<16x128xf32>
    %cst_34 = arith.constant dense<0.000000e+00> : vector<16x128xf32>
    %35 = tpu.matmul %34, %1, %cst_34 {dimension_numbers = #tpu.dot_dimension_numbers<[1], [0], [0], [1], [0, 0, 1, 1], [], []>} : vector<16x128xf32>, vector<128x128xf32>, vector<16x128xf32> -> vector<16x128xf32>
    %36 = arith.subf %34, %35 : vector<16x128xf32>
    %37 = arith.mulf %36, %36 : vector<16x128xf32>
    %cst_35 = arith.constant dense<0.000000e+00> : vector<16x128xf32>
    %38 = tpu.matmul %37, %1, %cst_35 {dimension_numbers = #tpu.dot_dimension_numbers<[1], [0], [0], [1], [0, 0, 1, 1], [], []>} : vector<16x128xf32>, vector<128x128xf32>, vector<16x128xf32> -> vector<16x128xf32>
    %cst_36 = arith.constant 9.99999974E-6 : f32
    %39 = vector.broadcast %cst_36 : f32 to vector<16x128xf32>
    %40 = arith.addf %38, %39 : vector<16x128xf32>
    %41 = math.rsqrt %40 : vector<16x128xf32>
    %42 = vector.extract_strided_slice %24 {offsets = [1, 0], sizes = [1, 128], strides = [1, 1]} : vector<3x128xf32> to vector<1x128xf32>
    %43 = vector.broadcast %42 : vector<1x128xf32> to vector<16x128xf32>
    %44 = arith.mulf %41, %43 : vector<16x128xf32>
    %45 = arith.mulf %36, %44 : vector<16x128xf32>
    %46 = vector.extract_strided_slice %24 {offsets = [2, 0], sizes = [1, 128], strides = [1, 1]} : vector<3x128xf32> to vector<1x128xf32>
    %47 = vector.broadcast %46 : vector<1x128xf32> to vector<16x128xf32>
    %48 = arith.addf %45, %47 : vector<16x128xf32>
    %cst_37 = arith.constant dense<0.000000e+00> : vector<16x128xf32>
    %49 = tpu.matmul %3, %48, %cst_37 {dimension_numbers = #tpu.dot_dimension_numbers<[1], [0], [0], [1], [0, 0, 1, 1], [], []>} : vector<16x16xf32>, vector<16x128xf32>, vector<16x128xf32> -> vector<16x128xf32>
    %c0_38 = arith.constant 0 : index
    %c0_39 = arith.constant 0 : index
    %c0_40 = arith.constant 0 : index
    %50 = vector.load %arg6[%c0_38, %c0_39, %c0_40] : memref<3x128x128xf32, #tpu.memory_space<vmem>>, vector<1x128x128xf32>
    %51 = vector.shape_cast %50 : vector<1x128x128xf32> to vector<128x128xf32>
    %cst_41 = arith.constant dense<0.000000e+00> : vector<16x128xf32>
    %52 = tpu.matmul %49, %51, %cst_41 {dimension_numbers = #tpu.dot_dimension_numbers<[1], [0], [0], [1], [0, 0, 1, 1], [], []>} : vector<16x128xf32>, vector<128x128xf32>, vector<16x128xf32> -> vector<16x128xf32>
    %cst_42 = arith.constant dense<0.000000e+00> : vector<16x128xf32>
    %53 = tpu.matmul %5, %48, %cst_42 {dimension_numbers = #tpu.dot_dimension_numbers<[1], [0], [0], [1], [0, 0, 1, 1], [], []>} : vector<16x16xf32>, vector<16x128xf32>, vector<16x128xf32> -> vector<16x128xf32>
    %c1_43 = arith.constant 1 : index
    %c0_44 = arith.constant 0 : index
    %c0_45 = arith.constant 0 : index
    %54 = vector.load %arg6[%c1_43, %c0_44, %c0_45] : memref<3x128x128xf32, #tpu.memory_space<vmem>>, vector<1x128x128xf32>
    %55 = vector.shape_cast %54 : vector<1x128x128xf32> to vector<128x128xf32>
    %cst_46 = arith.constant dense<0.000000e+00> : vector<16x128xf32>
    %56 = tpu.matmul %53, %55, %cst_46 {dimension_numbers = #tpu.dot_dimension_numbers<[1], [0], [0], [1], [0, 0, 1, 1], [], []>} : vector<16x128xf32>, vector<128x128xf32>, vector<16x128xf32> -> vector<16x128xf32>
    %57 = arith.addf %52, %56 : vector<16x128xf32>
    %cst_47 = arith.constant dense<0.000000e+00> : vector<16x128xf32>
    %58 = tpu.matmul %7, %48, %cst_47 {dimension_numbers = #tpu.dot_dimension_numbers<[1], [0], [0], [1], [0, 0, 1, 1], [], []>} : vector<16x16xf32>, vector<16x128xf32>, vector<16x128xf32> -> vector<16x128xf32>
    %c2_48 = arith.constant 2 : index
    %c0_49 = arith.constant 0 : index
    %c0_50 = arith.constant 0 : index
    %59 = vector.load %arg6[%c2_48, %c0_49, %c0_50] : memref<3x128x128xf32, #tpu.memory_space<vmem>>, vector<1x128x128xf32>
    %60 = vector.shape_cast %59 : vector<1x128x128xf32> to vector<128x128xf32>
    %cst_51 = arith.constant dense<0.000000e+00> : vector<16x128xf32>
    %61 = tpu.matmul %58, %60, %cst_51 {dimension_numbers = #tpu.dot_dimension_numbers<[1], [0], [0], [1], [0, 0, 1, 1], [], []>} : vector<16x128xf32>, vector<128x128xf32>, vector<16x128xf32> -> vector<16x128xf32>
    %62 = arith.addf %57, %61 : vector<16x128xf32>
    %cst_52 = arith.constant 0.000000e+00 : f32
    %63 = vector.broadcast %cst_52 : f32 to vector<16x128xf32>
    %64 = arith.maximumf %62, %63 : vector<16x128xf32>
    %c0_53 = arith.constant 0 : index
    %c0_54 = arith.constant 0 : index
    %65 = vector.load %arg9[%c0_53, %c0_54] : memref<3x128xf32, #tpu.memory_space<vmem>>, vector<3x128xf32>
    %c0_55 = arith.constant 0 : index
    %c0_56 = arith.constant 0 : index
    %66 = vector.load %arg7[%c0_55, %c0_56] : memref<128x128xf32, #tpu.memory_space<vmem>>, vector<128x128xf32>
    %cst_57 = arith.constant dense<0.000000e+00> : vector<16x128xf32>
    %67 = tpu.matmul %64, %66, %cst_57 {dimension_numbers = #tpu.dot_dimension_numbers<[1], [0], [0], [1], [0, 0, 1, 1], [], []>} : vector<16x128xf32>, vector<128x128xf32>, vector<16x128xf32> -> vector<16x128xf32>
    %c0_58 = arith.constant 0 : index
    %c0_59 = arith.constant 0 : index
    %68 = vector.load %arg8[%c0_58, %c0_59] : memref<128x128xf32, #tpu.memory_space<vmem>>, vector<128x128xf32>
    %cst_60 = arith.constant dense<0.000000e+00> : vector<16x128xf32>
    %69 = tpu.matmul %48, %68, %cst_60 {dimension_numbers = #tpu.dot_dimension_numbers<[1], [0], [0], [1], [0, 0, 1, 1], [], []>} : vector<16x128xf32>, vector<128x128xf32>, vector<16x128xf32> -> vector<16x128xf32>
    %70 = arith.addf %67, %69 : vector<16x128xf32>
    %71 = vector.extract_strided_slice %65 {offsets = [0, 0], sizes = [1, 128], strides = [1, 1]} : vector<3x128xf32> to vector<1x128xf32>
    %72 = vector.broadcast %71 : vector<1x128xf32> to vector<16x128xf32>
    %73 = arith.addf %70, %72 : vector<16x128xf32>
    %cst_61 = arith.constant 0.000000e+00 : f32
    %74 = vector.broadcast %cst_61 : f32 to vector<16x128xf32>
    %75 = arith.maximumf %73, %74 : vector<16x128xf32>
    %cst_62 = arith.constant dense<0.000000e+00> : vector<16x128xf32>
    %76 = tpu.matmul %75, %1, %cst_62 {dimension_numbers = #tpu.dot_dimension_numbers<[1], [0], [0], [1], [0, 0, 1, 1], [], []>} : vector<16x128xf32>, vector<128x128xf32>, vector<16x128xf32> -> vector<16x128xf32>
    %77 = arith.subf %75, %76 : vector<16x128xf32>
    %78 = arith.mulf %77, %77 : vector<16x128xf32>
    %cst_63 = arith.constant dense<0.000000e+00> : vector<16x128xf32>
    %79 = tpu.matmul %78, %1, %cst_63 {dimension_numbers = #tpu.dot_dimension_numbers<[1], [0], [0], [1], [0, 0, 1, 1], [], []>} : vector<16x128xf32>, vector<128x128xf32>, vector<16x128xf32> -> vector<16x128xf32>
    %cst_64 = arith.constant 9.99999974E-6 : f32
    %80 = vector.broadcast %cst_64 : f32 to vector<16x128xf32>
    %81 = arith.addf %79, %80 : vector<16x128xf32>
    %82 = math.rsqrt %81 : vector<16x128xf32>
    %83 = vector.extract_strided_slice %65 {offsets = [1, 0], sizes = [1, 128], strides = [1, 1]} : vector<3x128xf32> to vector<1x128xf32>
    %84 = vector.broadcast %83 : vector<1x128xf32> to vector<16x128xf32>
    %85 = arith.mulf %82, %84 : vector<16x128xf32>
    %86 = arith.mulf %77, %85 : vector<16x128xf32>
    %87 = vector.extract_strided_slice %65 {offsets = [2, 0], sizes = [1, 128], strides = [1, 1]} : vector<3x128xf32> to vector<1x128xf32>
    %88 = vector.broadcast %87 : vector<1x128xf32> to vector<16x128xf32>
    %89 = arith.addf %86, %88 : vector<16x128xf32>
    %c0_65 = arith.constant 0 : index
    %c0_66 = arith.constant 0 : index
    %90 = vector.load %arg11[%c0_65, %c0_66] : memref<128x12xf32, #tpu.memory_space<vmem>>, vector<128x12xf32>
    %cst_67 = arith.constant dense<0.000000e+00> : vector<16x12xf32>
    %91 = tpu.matmul %89, %90, %cst_67 {dimension_numbers = #tpu.dot_dimension_numbers<[1], [0], [0], [1], [0, 0, 1, 1], [], []>} : vector<16x128xf32>, vector<128x12xf32>, vector<16x12xf32> -> vector<16x12xf32>
    %c0_68 = arith.constant 0 : index
    %c0_69 = arith.constant 0 : index
    %92 = vector.load %arg12[%c0_68, %c0_69] : memref<1x12xf32, #tpu.memory_space<vmem>>, vector<1x12xf32>
    %93 = vector.broadcast %92 : vector<1x12xf32> to vector<16x12xf32>
    %94 = arith.addf %91, %93 : vector<16x12xf32>
    %c0_70 = arith.constant 0 : index
    %c0_71 = arith.constant 0 : index
    %95 = vector.load %arg13[%c0_70, %c0_71] : memref<16x12xf32, #tpu.memory_space<vmem>>, vector<16x12xf32>
    tpu.vector_store %arg13[%c0_70, %c0_71], %94 {strides = array<i32>} : memref<16x12xf32, #tpu.memory_space<vmem>>, vector<16x12xf32>,
    return
  }
}

</mosaic_0001>

<bundles_post_ra>
// kernel: run.1
= control target key start
LH: loop header
LB: loop body
LE: loop exit
PB: predicated region body
PF: predicated region fallthrough
CT: control target
= control target key end

     0   :  { %18 = vsyncpa [#allocation3], 0  ;;  %s4361_s0 = inlined_call_operand.vmem [shape: f32[16,128], index: 0, kind: input, shape index: {}]   ;;  %s4362_s1 = inlined_call_operand.vmem [shape: f32[3,16,16], index: 1, kind: input, shape index: {}]   ;;  %s4363_s2 = inlined_call_operand.vmem [shape: f32[3,128,128], index: 2, kind: input, shape index: {}]   ;;  %s4364_s3 = inlined_call_operand.vmem [shape: f32[128,128], index: 3, kind: input, shape index: {}]   ;;  %s4365_s4 = inlined_call_operand.hbm [shape: f32[128,128], index: 4, kind: input, shape index: {}]   ;;  %s4366_s5 = inlined_call_operand.hbm [shape: f32[3,128], index: 5, kind: input, shape index: {}]   ;;  %s4367_s6 = inlined_call_operand.vmem [shape: f32[3,128,128], index: 6, kind: input, shape index: {}]   ;;  %s4368_s7 = inlined_call_operand.hbm [shape: f32[128,128], index: 7, kind: input, shape index: {}]   ;;  %s4369_s8 = inlined_call_operand.hbm [shape: f32[128,128], index: 8, kind: input, shape index: {}]   ;;  %s4370_s9 = inlined_call_operand.hbm [shape: f32[3,128], index: 9, kind: input, shape index: {}]   ;;  %s4371_s10 = inlined_call_operand.hbm [shape: f32[128,128], index: 10, kind: input, shape index: {}]   ;;  %s4372_s11 = inlined_call_operand.vmem [shape: f32[128,12], index: 11, kind: input, shape index: {}]   ;;  %s4373_s12 = inlined_call_operand.vmem [shape: f32[1,12], index: 12, kind: input, shape index: {}]   ;;  %s4374_s13 = inlined_call_operand.vmem [shape: f32[16,12], index: 13, kind: output, shape index: {}]  }
   0x1   :  { %19 = vsyncpa [#allocation5], 0 }
   0x2   :  { %20 = vsyncpa [#allocation8], 0 }
   0x3   :  { %21 = vsyncpa [#allocation11], 0  ;;  %s3620_s25 = smov [#allocation4]   ;;  %s3480_s29 = scalar_lea.hbm %s4366_s5, 64 }
   0x4   :  { %s48_s26 = sshll.u32 %s3620_s25, 4  ;;  %p3481_p0 = scmp.ne.s32.totalorder %s4366_s5, %s3480_s29  ;;  %s49_s26 = int_to_ptr.vmem [resolvable:$true] %s48_s26 }
   0x5   :  { %p3484_p1 = scmp.lt.u32.totalorder %s3480_s29, %s4366_s5 }
   0x7   :  { %p3486_p2 = pnand %p3484_p1, %p3481_p0 }
   0x9   :  { %3489 = shalt.err (!%p3486_p2)
}
   0xa   :  { %s3490_s17 = scalar_lea.vmem %s49_s26, 64  ;;  %p3495_p4 = scmp.lt.s32.totalorder %s49_s26, %s49_s26 }
   0xb   :  { %p3491_p3 = scmp.ne.s32.totalorder %s49_s26, %s3490_s17  ;;  %p3496_p5 = scmp.lt.s32.totalorder %s3490_s17, %s3490_s17 }
   0xd   :  { %p3497_p6 = por %p3496_p5, %p3495_p4 }
   0xf   :  { %p3498_p7 = pnand %p3497_p6, %p3491_p3 }
  0x11   :  { %3501 = shalt.err (!%p3498_p7)
}
  0x12   :  { %51 = dma.hbm_to_vmem [thread:$0]  %s4366_s5, 64, %s49_s26, [#allocation5]  }
  0x13   :  { %s3621_s20 = smov [#allocation7]   ;;  %s3622_s22 = smov [#allocation2]  }
  0x14   :  { %s71_s21 = sshll.u32 %s3621_s20, 4  ;;  %s35_s23 = sshll.u32 %s3622_s22, 4  ;;  %s72_s21 = int_to_ptr.vmem [resolvable:$true] %s71_s21  ;;  %s36_s23 = int_to_ptr.vmem [resolvable:$true] %s35_s23 }
  0x15   :  { %s3502_s27 = scalar_lea.hbm %s4369_s8, 2048 }
  0x16   :  { %p3503_p8 = scmp.ne.s32.totalorder %s4369_s8, %s3502_s27  ;;  %p3506_p9 = scmp.lt.u32.totalorder %s3502_s27, %s4369_s8 }
  0x18   :  { %p3508_p10 = pnand %p3506_p9, %p3503_p8 }
  0x1a   :  { %3511 = shalt.err (!%p3508_p10)
}
  0x1b   :  { %s3512_s5 = scalar_lea.vmem %s72_s21, 2048  ;;  %p3517_p12 = scmp.lt.s32.totalorder %s72_s21, %s72_s21 }
  0x1c   :  { %p3513_p11 = scmp.ne.s32.totalorder %s72_s21, %s3512_s5  ;;  %p3518_p13 = scmp.lt.s32.totalorder %s3512_s5, %s3512_s5 }
  0x1e   :  { %p3519_p0 = por %p3518_p13, %p3517_p12 }
  0x20   :  { %p3520_p1 = pnand %p3519_p0, %p3513_p11 }
  0x22   :  { %3523 = shalt.err (!%p3520_p1)
}
  0x23   :  { %s3623_s26 = smov 128   ;;  %s3624_s15 = smov 8  }
  0x24   :  { %77 = dma.hbm_to_vmem [thread:$0]  %s4369_s8, 2048, %s72_s21, [#allocation8], %s3623_s26, %s3623_s26, %s3624_s15  }
  0x25   :  { %s3524_s20 = scalar_lea.hbm %s4365_s4, 2048 }
  0x26   :  { %p3525_p2 = scmp.ne.s32.totalorder %s4365_s4, %s3524_s20  ;;  %p3528_p3 = scmp.lt.u32.totalorder %s3524_s20, %s4365_s4 }
  0x28   :  { %p3530_p4 = pnand %p3528_p3, %p3525_p2 }
  0x2a   :  { %3533 = shalt.err (!%p3530_p4)
}
  0x2b   :  { %s3534_s28 = scalar_lea.vmem %s36_s23, 2048  ;;  %p3539_p6 = scmp.lt.s32.totalorder %s36_s23, %s36_s23 }
  0x2c   :  { %p3535_p5 = scmp.ne.s32.totalorder %s36_s23, %s3534_s28  ;;  %p3540_p7 = scmp.lt.s32.totalorder %s3534_s28, %s3534_s28 }
  0x2e   :  { %p3541_p8 = por %p3540_p7, %p3539_p6 }
  0x30   :  { %p3542_p9 = pnand %p3541_p8, %p3535_p5 }
  0x32   :  { %3545 = shalt.err (!%p3542_p9)
}
  0x33   :  { %41 = dma.hbm_to_vmem [thread:$0]  %s4365_s4, 2048, %s36_s23, [#allocation3], %s3623_s26, %s3623_s26, %s3624_s15  }
  0x34   :  { %s3625_s29 = smov [#allocation6]   ;;  %s3626_s14 = smov [#allocation9]  }
  0x35   :  { %s59_s30 = sshll.u32 %s3625_s29, 4  ;;  %s84_s5 = sshll.u32 %s3626_s14, 4  ;;  %s60_s30 = int_to_ptr.vmem [resolvable:$true] %s59_s30  ;;  %s85_s5 = int_to_ptr.vmem [resolvable:$true] %s84_s5 }
  0x36   :  { %s3546_s18 = scalar_lea.hbm %s4368_s7, 2048 }
  0x37   :  { %p3547_p10 = scmp.ne.s32.totalorder %s4368_s7, %s3546_s18  ;;  %p3550_p11 = scmp.lt.u32.totalorder %s3546_s18, %s4368_s7 }
  0x39   :  { %p3552_p12 = pnand %p3550_p11, %p3547_p10 }
  0x3b   :  { %3555 = shalt.err (!%p3552_p12)
}
  0x3c   :  { %s3556_s4 = scalar_lea.vmem %s60_s30, 2048  ;;  %p3561_p0 = scmp.lt.s32.totalorder %s60_s30, %s60_s30 }
  0x3d   :  { %p3557_p13 = scmp.ne.s32.totalorder %s60_s30, %s3556_s4  ;;  %p3562_p1 = scmp.lt.s32.totalorder %s3556_s4, %s3556_s4 }
  0x3f   :  { %p3563_p2 = por %p3562_p1, %p3561_p0 }
  0x41   :  { %p3564_p3 = pnand %p3563_p2, %p3557_p13 }
  0x43   :  { %3567 = shalt.err (!%p3564_p3)
}
  0x44   :  { %65 = dma.hbm_to_vmem [thread:$0]  %s4368_s7, 2048, %s60_s30, [#allocation5], %s3623_s26, %s3623_s26, %s3624_s15  }
  0x45   :  { %s3568_s8 = scalar_lea.hbm %s4370_s9, 64 }
  0x46   :  { %p3569_p4 = scmp.ne.s32.totalorder %s4370_s9, %s3568_s8  ;;  %p3572_p5 = scmp.lt.u32.totalorder %s3568_s8, %s4370_s9 }
  0x48   :  { %p3574_p6 = pnand %p3572_p5, %p3569_p4 }
  0x4a   :  { %3577 = shalt.err (!%p3574_p6)
}
  0x4b   :  { %s3578_s17 = scalar_lea.vmem %s85_s5, 64  ;;  %p3583_p8 = scmp.lt.s32.totalorder %s85_s5, %s85_s5 }
  0x4c   :  { %p3579_p7 = scmp.ne.s32.totalorder %s85_s5, %s3578_s17  ;;  %p3584_p9 = scmp.lt.s32.totalorder %s3578_s17, %s3578_s17 }
  0x4e   :  { %p3585_p10 = por %p3584_p9, %p3583_p8 }
  0x50   :  { %p3586_p11 = pnand %p3585_p10, %p3579_p7 }
  0x52   :  { %3589 = shalt.err (!%p3586_p11)
}
  0x53   :  { %87 = dma.hbm_to_vmem [thread:$0]  %s4370_s9, 64, %s85_s5, [#allocation8]  }
  0x54   :  { %s3627_s18 = smov [#allocation10]   ;;  %s3590_s24 = scalar_lea.hbm %s4371_s10, 2048 }
  0x55   :  { %s93_s19 = sshll.u32 %s3627_s18, 4  ;;  %p3591_p12 = scmp.ne.s32.totalorder %s4371_s10, %s3590_s24  ;;  %s94_s19 = int_to_ptr.vmem [resolvable:$true] %s93_s19 }
  0x56   :  { %p3594_p13 = scmp.lt.u32.totalorder %s3590_s24, %s4371_s10 }
  0x58   :  { %p3596_p0 = pnand %p3594_p13, %p3591_p12 }
  0x5a   :  { %3599 = shalt.err (!%p3596_p0)
}
  0x5b   :  { %s3600_s28 = scalar_lea.vmem %s94_s19, 2048  ;;  %p3605_p2 = scmp.lt.s32.totalorder %s94_s19, %s94_s19 }
  0x5c   :  { %p3601_p1 = scmp.ne.s32.totalorder %s94_s19, %s3600_s28  ;;  %p3606_p3 = scmp.lt.s32.totalorder %s3600_s28, %s3600_s28 }
  0x5e   :  { %p3607_p4 = por %p3606_p3, %p3605_p2 }
  0x60   :  { %p3608_p5 = pnand %p3607_p4, %p3601_p1 }
  0x62   :  { %3611 = shalt.err (!%p3608_p5)
}
  0x63   :  { %99 = dma.hbm_to_vmem [thread:$0]  %s4371_s10, 2048, %s94_s19, [#allocation11], %s3623_s26, %s3623_s26, %s3624_s15  }
  0x64   :  { %3612 = dma.done.wait [#allocation3], 2048  }
  0x65   :  { %3613 = vsyncadd [#allocation3], 4294965248 }
  0x66   :  { %3614 = dma.done.wait [#allocation5], 2112  }
  0x67   :  { %3615 = vsyncadd [#allocation5], 4294965184 }
  0x68   :  { %3616 = dma.done.wait [#allocation8], 2112  }
  0x69   :  { %3617 = vsyncadd [#allocation8], 4294965184 }
  0x6a   :  { %3618 = dma.done.wait [#allocation11], 2048  }
  0x6b   :  { %3619 = vsyncadd [#allocation11], 4294965248  ;;  %vm148_vm0 = vcmask 130048   ;;  %v122_v0 = vld [vmem:[%s4361_s0] sm:$0xff]  ;;  %v3788_v1 = vld [vmem:[%s4361_s0 + $0x8] sm:$0xff]  ;;  %vm1995_vm1 = vcmask 97280  }
  0x6c   :  { %v3793_v2 = vld [vmem:[%s4362_s1] sm:$0xff]  ;;  %v2948_v3 = vpack.c.bf16 %v3788_v1, %v122_v0  ;;  %v2015_v5 = vld [vmem:[%s4363_s2 + $0x88] sm:$0xff]  ;;  %v2016_v6 = vld [vmem:[%s4363_s2 + $0x90] sm:$0xff] }
  0x6d   :  { %2385 = vmatprep.mubr.msk.f32.mxu1 %vm148_vm0, %v3793_v2  ;;  %v2014_v4 = vld [vmem:[%s4363_s2 + $0x80] sm:$0xff]  ;;  %v2017_v7 = vld [vmem:[%s4363_s2 + $0x98] sm:$0xff]  ;;  %v3813_v8 = vld [vmem:[%s4362_s1 + $0x8] sm:$0xff] }
  0x6e   :  { %2949 = vmatprep.subr.bf16.mxu1 %v2948_v3  ;;  %v2956_v9 = vpack.c.bf16 %v2015_v5, %v2014_v4  ;;  %v3818_v10 = vld [vmem:[%s4362_s1 + $0x10] sm:$0xff]  ;;  %v2960_v11 = vpack.c.bf16 %v2017_v7, %v2016_v6  ;;  %v2018_v12 = vld [vmem:[%s4363_s2 + $0xa0] sm:$0xff]  ;;  %v2019_v13 = vld [vmem:[%s4363_s2 + $0xa8] sm:$0xff] }
  0x6f   :  { %2951 = vmatpush3.bf16.msra.mxu1 %v2948_v3  ;;  %v3833_v14 = vld [vmem:[%s4362_s1 + $0x18] sm:$0xff]  ;;  %v3838_v15 = vld [vmem:[%s4362_s1 + $0x20] sm:$0xff]  ;;  %v2964_v16 = vpack.c.bf16 %v2019_v13, %v2018_v12  ;;  %v2020_v17 = vld [vmem:[%s4363_s2 + $0xb0] sm:$0xff] }
  0x70   :  { %2953 = vmatprep.subr.bf16.mxu1 %v2948_v3  ;;  %2957 = vmatprep.subr.bf16.mxu0 %v2956_v9  ;;  %v2021_v18 = vld [vmem:[%s4363_s2 + $0xb8] sm:$0xff]  ;;  %v3853_v19 = vld [vmem:[%s4362_s1 + $0x28] sm:$0xff]  ;;  %v2022_v21 = vld [vmem:[%s4363_s2 + $0xc0] sm:$0xff] }
  0x71   :  { %2959 = vmatpush3.bf16.msra.mxu0 %v2956_v9  ;;  %v2968_v20 = vpack.c.bf16 %v2021_v18, %v2020_v17  ;;  %v2023_v22 = vld [vmem:[%s4363_s2 + $0xc8] sm:$0xff]  ;;  %v2024_v24 = vld [vmem:[%s4363_s2 + $0xd0] sm:$0xff]  ;;  %v2025_v25 = vld [vmem:[%s4363_s2 + $0xd8] sm:$0xff] }
  0x72   :  { %2386 = vmatmul.mubr.msk.f32.vlgmr.msra.gmra.mrb[0].mxu1 %vm148_vm0, %v3813_v8  ;;  %2961 = vmatprep.subr.bf16.mxu0 %v2960_v11  ;;  %v2972_v23 = vpack.c.bf16 %v2023_v22, %v2022_v21  ;;  %v2976_v26 = vpack.c.bf16 %v2025_v25, %v2024_v24  ;;  %v2026_v27 = vld [vmem:[%s4363_s2 + $0xe0] sm:$0xff]  ;;  %v2027_v28 = vld [vmem:[%s4363_s2 + $0xe8] sm:$0xff]  ;;  %v2028_v30 = vld [vmem:[%s4363_s2 + $0xf0] sm:$0xff] }
  0x73   :  { %2955 = vmatpush3.bf16.msra.mxu1 %v2948_v3  ;;  %2392 = vmatprep.mubr.msk.f32.mxu1 %vm148_vm0, %v3818_v10  ;;  %v2980_v29 = vpack.c.bf16 %v2027_v28, %v2026_v27  ;;  %v2029_v31 = vld [vmem:[%s4363_s2 + $0xf8] sm:$0xff]  ;;  %v230_v33 = vld [vmem:[%s4363_s2] sm:$0xff]  ;;  %v231_v34 = vld [vmem:[%s4363_s2 + $0x8] sm:$0xff] }
  0x74   :  { %3021 = vmatprep.subr.bf16.mxu1 %v2948_v3  ;;  %v2984_v32 = vpack.c.bf16 %v2029_v31, %v2028_v30  ;;  %v3887_v35 = vpack.c.bf16 %v231_v34, %v230_v33  ;;  %v688_v36 = vld [vmem:[#allocation2] sm:$0xff]  ;;  %v689_v37 = vld [vmem:[#allocation2 + $0x8] sm:$0xff]  ;;  %v690_v38 = vld [vmem:[#allocation2 + $0x10] sm:$0xff] }
  0x75   :  { %2963 = vmatpush3.bf16.msra.mxu0 %v2960_v11  ;;  %v3056_v39 = vpack.c.bf16 %v689_v37, %v688_v36  ;;  %v691_v40 = vld [vmem:[#allocation2 + $0x18] sm:$0xff]  ;;  %v692_v42 = vld [vmem:[#allocation2 + $0x20] sm:$0xff]  ;;  %v693_v43 = vld [vmem:[#allocation2 + $0x28] sm:$0xff] }
  0x76   :  { %2393 = vmatmul.mubr.msk.f32.vlgmr.msra.gmra.mrb[2].mxu1 %vm148_vm0, %v3833_v14  ;;  %2965 = vmatprep.subr.bf16.mxu0 %v2964_v16  ;;  %v3060_v41 = vpack.c.bf16 %v691_v40, %v690_v38  ;;  %v3064_v44 = vpack.c.bf16 %v693_v43, %v692_v42  ;;  %v694_v45 = vld [vmem:[#allocation2 + $0x30] sm:$0xff]  ;;  %v695_v46 = vld [vmem:[#allocation2 + $0x38] sm:$0xff]  ;;  %v696_v48 = vld [vmem:[#allocation2 + $0x40] sm:$0xff] }
  0x77   :  { %3023 = vmatpush3.bf16.msra.mxu1 %v2948_v3  ;;  %2469 = vmatprep.mubr.msk.f32.mxu1 %vm148_vm0, %v3838_v15  ;;  %v3068_v47 = vpack.c.bf16 %v695_v46, %v694_v45  ;;  %v697_v49 = vld [vmem:[#allocation2 + $0x48] sm:$0xff]  ;;  %v698_v51 = vld [vmem:[#allocation2 + $0x50] sm:$0xff]  ;;  %v699_v52 = vld [vmem:[#allocation2 + $0x58] sm:$0xff] }
  0x78   :  { %3057 = vmatprep.subr.bf16.mxu1 %v3056_v39  ;;  %v3072_v50 = vpack.c.bf16 %v697_v49, %v696_v48  ;;  %v3076_v53 = vpack.c.bf16 %v699_v52, %v698_v51  ;;  %v700_v54 = vld [vmem:[#allocation2 + $0x60] sm:$0xff]  ;;  %v701_v55 = vld [vmem:[#allocation2 + $0x68] sm:$0xff]  ;;  %v702_v57 = vld [vmem:[#allocation2 + $0x70] sm:$0xff] }
  0x79   :  { %2967 = vmatpush3.bf16.msra.mxu0 %v2964_v16  ;;  %v3080_v56 = vpack.c.bf16 %v701_v55, %v700_v54  ;;  %v703_v58 = vld [vmem:[#allocation2 + $0x78] sm:$0xff]  ;;  %v672_v60 = vld [vmem:[%s4364_s3] sm:$0xff]  ;;  %v673_v61 = vld [vmem:[%s4364_s3 + $0x8] sm:$0xff] }
  0x7a   :  { %2470 = vmatmul.mubr.msk.f32.vlgmr.msra.gmra.mrb[4].mxu1 %vm148_vm0, %v3853_v19  ;;  %2969 = vmatprep.subr.bf16.mxu0 %v2968_v20  ;;  %v3084_v59 = vpack.c.bf16 %v703_v58, %v702_v57  ;;  %v3088_v62 = vpack.c.bf16 %v673_v61, %v672_v60  ;;  %v674_v63 = vld [vmem:[%s4364_s3 + $0x10] sm:$0xff]  ;;  %v676_v4 = vld [vmem:[%s4364_s3 + $0x20] sm:$0xff]  ;;  %v677_v5 = vld [vmem:[%s4364_s3 + $0x28] sm:$0xff] }
  0x7b   :  { %2539 = vmatprep.mubr.f32.mxu1 %v122_v0  ;;  %3059 = vmatpush3.bf16.msra.mxu1 %v3056_v39  ;;  %v675_v0 = vld [vmem:[%s4364_s3 + $0x18] sm:$0xff]  ;;  %v3096_v6 = vpack.c.bf16 %v677_v5, %v676_v4  ;;  %v678_v7 = vld [vmem:[%s4364_s3 + $0x30] sm:$0xff]  ;;  %v680_v12 = vld [vmem:[%s4364_s3 + $0x40] sm:$0xff] }
  0x7c   :  { %3061 = vmatprep.subr.bf16.mxu1 %v3060_v41  ;;  %v3092_v3 = vpack.c.bf16 %v675_v0, %v674_v63  ;;  %v679_v9 = vld [vmem:[%s4364_s3 + $0x38] sm:$0xff]  ;;  %v682_v16 = vld [vmem:[%s4364_s3 + $0x50] sm:$0xff]  ;;  %v685_v21 = vld [vmem:[%s4364_s3 + $0x68] sm:$0xff] }
  0x7d   :  { %2971 = vmatpush3.bf16.msra.mxu0 %v2968_v20  ;;  %v3100_v11 = vpack.c.bf16 %v679_v9, %v678_v7  ;;  %v683_v17 = vld [vmem:[%s4364_s3 + $0x58] sm:$0xff]  ;;  %v684_v20 = vld [vmem:[%s4364_s3 + $0x60] sm:$0xff]  ;;  %v232_v25 = vld [vmem:[%s4363_s2 + $0x10] sm:$0xff] }
  0x7e   :  { %2973 = vmatprep.subr.bf16.mxu0 %v2972_v23  ;;  %v3108_v18 = vpack.c.bf16 %v683_v17, %v682_v16  ;;  %v3112_v22 = vpack.c.bf16 %v685_v21, %v684_v20  ;;  %v234_v30 = vld [vmem:[%s4363_s2 + $0x20] sm:$0xff]  ;;  %v235_v31 = vld [vmem:[%s4363_s2 + $0x28] sm:$0xff]  ;;  %v236_v36 = vld [vmem:[%s4363_s2 + $0x30] sm:$0xff] }
  0x7f   :  { %3063 = vmatpush3.bf16.msra.mxu1 %v3060_v41  ;;  %v2996_v33 = vpack.c.bf16 %v235_v31, %v234_v30  ;;  %v237_v37 = vld [vmem:[%s4363_s2 + $0x38] sm:$0xff]  ;;  %v239_v39 = vld [vmem:[%s4363_s2 + $0x48] sm:$0xff]  ;;  %v240_v41 = vld [vmem:[%s4363_s2 + $0x50] sm:$0xff] }
  0x80   :  { %3065 = vmatprep.subr.bf16.mxu1 %v3064_v44  ;;  %v3000_v38 = vpack.c.bf16 %v237_v37, %v236_v36  ;;  %v241_v42 = vld [vmem:[%s4363_s2 + $0x58] sm:$0xff]  ;;  %v243_v45 = vld [vmem:[%s4363_s2 + $0x68] sm:$0xff]  ;;  %v125_v20 = vld [vmem:[#allocation10 + $0x8] sm:$0xff] }
  0x81   :  { %2975 = vmatpush3.bf16.msra.mxu0 %v2972_v23  ;;  %v3008_v43 = vpack.c.bf16 %v241_v42, %v240_v41  ;;  %v245_v48 = vld [vmem:[%s4363_s2 + $0x78] sm:$0xff]  ;;  %v2033_v51 = vld [vmem:[%s4363_s2 + $0x108] sm:$0xff]  ;;  %v135_v36 = vld [vmem:[#allocation10 + $0x58] sm:$0xff] }
  0x82   :  { %2977 = vmatprep.subr.bf16.mxu0 %v2976_v26  ;;  %v2035_v54 = vld [vmem:[%s4363_s2 + $0x118] sm:$0xff]  ;;  %v2037_v57 = vld [vmem:[%s4363_s2 + $0x128] sm:$0xff] }
  0x83   :  { %3067 = vmatpush3.bf16.msra.mxu1 %v3064_v44  ;;  %v242_v44 = vld [vmem:[%s4363_s2 + $0x60] sm:$0xff]  ;;  %v2039_v60 = vld [vmem:[%s4363_s2 + $0x138] sm:$0xff]  ;;  %v2041_v63 = vld [vmem:[%s4363_s2 + $0x148] sm:$0xff] }
  0x84   :  { %3069 = vmatprep.subr.bf16.mxu1 %v3068_v47  ;;  %v3012_v46 = vpack.c.bf16 %v243_v45, %v242_v44  ;;  %v2043_v4 = vld [vmem:[%s4363_s2 + $0x158] sm:$0xff]  ;;  %v2045_v7 = vld [vmem:[%s4363_s2 + $0x168] sm:$0xff]  ;;  %v139_v45 = vld [vmem:[#allocation10 + $0x78] sm:$0xff] }
  0x85   :  { %2979 = vmatpush3.bf16.msra.mxu0 %v2976_v26  ;;  %v233_v26 = vld [vmem:[%s4363_s2 + $0x18] sm:$0xff]  ;;  %v132_v31 = vld [vmem:[#allocation10 + $0x40] sm:$0xff] }
  0x86   :  { %2981 = vmatprep.subr.bf16.mxu0 %v2980_v29  ;;  %v687_v16 = vld [vmem:[%s4364_s3 + $0x78] sm:$0xff] }
  0x87   :  { %3071 = vmatpush3.bf16.msra.mxu1 %v3068_v47  ;;  %v244_v47 = vld [vmem:[%s4363_s2 + $0x70] sm:$0xff]  ;;  %v138_v44 = vld [vmem:[#allocation10 + $0x70] sm:$0xff] }
  0x88   :  { %3073 = vmatprep.subr.bf16.mxu1 %v3072_v50  ;;  %v3016_v49 = vpack.c.bf16 %v245_v48, %v244_v47  ;;  %v854_v47 = vlaneseq }
  0x89   :  { %2983 = vmatpush3.bf16.msra.mxu0 %v2980_v29  ;;  %v2992_v29 = vpack.c.bf16 %v233_v26, %v232_v25  ;;  %v128_v25 = vld [vmem:[#allocation10 + $0x20] sm:$0xff]  ;;  %v129_v26 = vld [vmem:[#allocation10 + $0x28] sm:$0xff] }
  0x8a   :  { %2985 = vmatprep.subr.bf16.mxu0 %v2984_v32  ;;  %v4081_v48 = vshrl.u32 %v854_v47, 7 }
  0x8b   :  { %3075 = vmatpush3.bf16.msra.mxu1 %v3072_v50  ;;  %v2032_v50 = vld [vmem:[%s4363_s2 + $0x100] sm:$0xff] }
  0x8c   :  { %3077 = vmatprep.subr.bf16.mxu1 %v3076_v53  ;;  %v3024_v52 = vpack.c.bf16 %v2033_v51, %v2032_v50  ;;  %v4084_v50 = vld [vmem:[#allocation4] sm:$0x7] }
  0x8d   :  { %2987 = vmatpush3.bf16.msra.mxu0 %v2984_v32 }
  0x8e   :  { %2989 = vmatprep.subr.bf16.mxu0 %v3887_v35 }
  0x8f   :  { %3079 = vmatpush3.bf16.msra.mxu1 %v3076_v53  ;;  %v2034_v53 = vld [vmem:[%s4363_s2 + $0x110] sm:$0xff] }
  0x90   :  { %3081 = vmatprep.subr.bf16.mxu1 %v3080_v56  ;;  %v3028_v55 = vpack.c.bf16 %v2035_v54, %v2034_v53 }
  0x93   :  { %3083 = vmatpush3.bf16.msra.mxu1 %v3080_v56  ;;  %v2036_v56 = vld [vmem:[%s4363_s2 + $0x120] sm:$0xff] }
  0x94   :  { %3085 = vmatprep.subr.bf16.mxu1 %v3084_v59  ;;  %v3032_v58 = vpack.c.bf16 %v2037_v57, %v2036_v56 }
  0x97   :  { %3087 = vmatpush3.bf16.msra.mxu1 %v3084_v59  ;;  %v2038_v59 = vld [vmem:[%s4363_s2 + $0x130] sm:$0xff] }
  0x98   :  { %3089 = vmatprep.subr.bf16.mxu1 %v3088_v62  ;;  %v3036_v61 = vpack.c.bf16 %v2039_v60, %v2038_v59  ;;  %v1554_v59 = vld [vmem:[#allocation7 + $0x8] sm:$0xff] }
  0x9a   :  { %2540 = vmatmul.mubr.f32.vlgmr.msra.gmra.mrb[6].mxu1 %v3788_v1  ;;  %v681_v1 = vld [vmem:[%s4364_s3 + $0x48] sm:$0xff] }
  0x9b   :  { %3091 = vmatpush3.bf16.msra.mxu1 %v3088_v62  ;;  %v3104_v13 = vpack.c.bf16 %v681_v1, %v680_v12  ;;  %v2040_v62 = vld [vmem:[%s4363_s2 + $0x140] sm:$0xff]  ;;  %v2047_v12 = vld [vmem:[%s4363_s2 + $0x178] sm:$0xff] }
  0x9c   :  { %3093 = vmatprep.subr.bf16.mxu1 %v3092_v3  ;;  %v3040_v0 = vpack.c.bf16 %v2041_v63, %v2040_v62 }
  0x9f   :  { %3095 = vmatpush3.bf16.msra.mxu1 %v3092_v3  ;;  %v2042_v3 = vld [vmem:[%s4363_s2 + $0x150] sm:$0xff] }
  0xa0   :  { %3097 = vmatprep.subr.bf16.mxu1 %v3096_v6  ;;  %v3044_v5 = vpack.c.bf16 %v2043_v4, %v2042_v3  ;;  %v1555_v3 = vld [vmem:[#allocation7 + $0x10] sm:$0xff]  ;;  %v1556_v4 = vld [vmem:[#allocation7 + $0x18] sm:$0xff] }
  0xa3   :  { %3099 = vmatpush3.bf16.msra.mxu1 %v3096_v6  ;;  %v2044_v6 = vld [vmem:[%s4363_s2 + $0x160] sm:$0xff] }
  0xa4   :  { %3101 = vmatprep.subr.bf16.mxu1 %v3100_v11  ;;  %v3048_v9 = vpack.c.bf16 %v2045_v7, %v2044_v6  ;;  %v3296_v7 = vpack.c.bf16 %v1556_v4, %v1555_v3  ;;  %v2060_v4 = vld [vmem:[%s4367_s6 + $0xc0] sm:$0xff] }
  0xa7   :  { %3103 = vmatpush3.bf16.msra.mxu1 %v3100_v11  ;;  %v2046_v11 = vld [vmem:[%s4363_s2 + $0x170] sm:$0xff] }
  0xa8   :  { %3105 = vmatprep.subr.bf16.mxu1 %v3104_v13  ;;  %v3052_v1 = vpack.c.bf16 %v2047_v12, %v2046_v11  ;;  %v1558_v11 = vld [vmem:[#allocation7 + $0x28] sm:$0xff]  ;;  %v1559_v12 = vld [vmem:[#allocation7 + $0x30] sm:$0xff] }
  0xab   :  { %3107 = vmatpush3.bf16.msra.mxu1 %v3104_v13  ;;  %v686_v13 = vld [vmem:[%s4364_s3 + $0x70] sm:$0xff] }
  0xac   :  { %3109 = vmatprep.subr.bf16.mxu1 %v3108_v18  ;;  %v3116_v17 = vpack.c.bf16 %v687_v16, %v686_v13  ;;  %v1561_v16 = vld [vmem:[#allocation7 + $0x40] sm:$0xff] }
  0xaf   :  { %3111 = vmatpush3.bf16.msra.mxu1 %v3108_v18  ;;  %v124_v18 = vld [vmem:[#allocation10] sm:$0xff] }
  0xb0   :  { %3113 = vmatprep.subr.bf16.mxu1 %v3112_v22  ;;  %v4033_v21 = vpack.c.bf16 %v125_v20, %v124_v18  ;;  %v1563_v20 = vld [vmem:[#allocation7 + $0x50] sm:$0xff] }
  0xb3   :  { %3115 = vmatpush3.bf16.msra.mxu1 %v3112_v22  ;;  %v126_v22 = vld [vmem:[#allocation10 + $0x10] sm:$0xff] }
  0xb4   :  { %3117 = vmatprep.subr.bf16.mxu1 %v3116_v17 }
  0xb7   :  { %3119 = vmatpush3.bf16.msra.mxu1 %v3116_v17  ;;  %v1562_v17 = vld [vmem:[#allocation7 + $0x48] sm:$0xff] }
  0xb8   :  { %3121 = vmatprep.subr.bf16.mxu1 %v4033_v21  ;;  %v3308_v18 = vpack.c.bf16 %v1562_v17, %v1561_v16  ;;  %v1107_v17 = vld [vmem:[%s4367_s6] sm:$0xff] }
 0x145   :  { %v2387_v23 = vpop.f32.mrb[0].mxu1 }
 0x146   :  { %v221_v24 = vpop.f32.mrb[1].mxu1 }
 0x149   :  { %v2394_v27 = vpop.f32.mrb[2].mxu1 }
 0x14a   :  { %v318_v28 = vpop.f32.mrb[3].mxu1 }
 0x14b   :  { %2427 = vmatprep.mubr.f32.mxu0 %v318_v28  ;;  %v130_v28 = vld [vmem:[#allocation10 + $0x30] sm:$0xff] }
 0x14c   :  { %2428 = vmatmul.mubr.f32.vlgmr.msra.gmra.mrb[0].mxu0 %v2394_v27  ;;  %v4041_v27 = vpack.c.bf16 %v129_v26, %v128_v25  ;;  %v1565_v25 = vld [vmem:[#allocation7 + $0x60] sm:$0xff]  ;;  %v1566_v26 = vld [vmem:[#allocation7 + $0x68] sm:$0xff] }
 0x14d   :  { %2991 = vmatpush3.bf16.msra.mxu0 %v3887_v35  ;;  %2462 = vmatprep.mubr.f32.mxu0 %v221_v24  ;;  %v3946_v32 = vpop.f32.mrb[4].mxu1  ;;  %v238_v35 = vld [vmem:[%s4363_s2 + $0x40] sm:$0xff] }
 0x14e   :  { %2993 = vmatprep.subr.bf16.mxu0 %v2992_v29  ;;  %v566_v34 = vpop.f32.mrb[5].mxu1  ;;  %v3004_v40 = vpack.c.bf16 %v239_v39, %v238_v35  ;;  %v137_v35 = vld [vmem:[#allocation10 + $0x68] sm:$0xff] }
 0x151   :  { %2995 = vmatpush3.bf16.msra.mxu0 %v2992_v29  ;;  %v131_v29 = vld [vmem:[#allocation10 + $0x38] sm:$0xff] }
 0x152   :  { %2997 = vmatprep.subr.bf16.mxu0 %v2996_v33  ;;  %v4045_v30 = vpack.c.bf16 %v131_v29, %v130_v28  ;;  %v3316_v28 = vpack.c.bf16 %v1566_v26, %v1565_v25  ;;  %v1567_v29 = vld [vmem:[#allocation7 + $0x70] sm:$0xff] }
 0x153   :  { %v1109_v25 = vld [vmem:[%s4367_s6 + $0x10] sm:$0xff]  ;;  %v1110_v26 = vld [vmem:[%s4367_s6 + $0x18] sm:$0xff] }
 0x155   :  { %2999 = vmatpush3.bf16.msra.mxu0 %v2996_v33 }
 0x156   :  { %3001 = vmatprep.subr.bf16.mxu0 %v3000_v38 }
 0x159   :  { %3003 = vmatpush3.bf16.msra.mxu0 %v3000_v38  ;;  %v136_v38 = vld [vmem:[#allocation10 + $0x60] sm:$0xff] }
 0x15a   :  { %3005 = vmatprep.subr.bf16.mxu0 %v3004_v40  ;;  %v4057_v39 = vpack.c.bf16 %v137_v35, %v136_v38 }
 0x15d   :  { %3007 = vmatpush3.bf16.msra.mxu0 %v3004_v40 }
 0x15e   :  { %3009 = vmatprep.subr.bf16.mxu0 %v3008_v43 }
 0x161   :  { %3011 = vmatpush3.bf16.msra.mxu0 %v3008_v43 }
 0x162   :  { %3013 = vmatprep.subr.bf16.mxu0 %v3012_v46 }
 0x165   :  { %3015 = vmatpush3.bf16.msra.mxu0 %v3012_v46  ;;  %v4075_v46 = vpack.c.bf16 %v139_v45, %v138_v44 }
 0x166   :  { %3017 = vmatprep.subr.bf16.mxu0 %v3016_v49 }
 0x169   :  { %3019 = vmatpush3.bf16.msra.mxu0 %v3016_v49  ;;  %v856_v49 = vsub.s32 0, %v4081_v48 }
 0x16a   :  { %3025 = vmatprep.subr.bf16.mxu0 %v3024_v52 }
 0x16b   :  { %v857_v51 = vrot.slane %v4084_v50, %v856_v49 }
 0x16c   :  { %2463 = vmatmul.mubr.f32.vlgmr.msra.gmra.mrb[0].mxu0 %v2387_v23  ;;  %v127_v23 = vld [vmem:[#allocation10 + $0x18] sm:$0xff] }
 0x16d   :  { %3027 = vmatpush3.bf16.msra.mxu0 %v3024_v52  ;;  %2504 = vmatprep.mubr.f32.mxu0 %v566_v34  ;;  %v4036_v24 = vpack.c.bf16 %v127_v23, %v126_v22  ;;  %v134_v34 = vld [vmem:[#allocation10 + $0x50] sm:$0xff] }
 0x16e   :  { %3029 = vmatprep.subr.bf16.mxu0 %v3028_v55  ;;  %v4053_v37 = vpack.c.bf16 %v135_v36, %v134_v34  ;;  %v1564_v22 = vld [vmem:[#allocation7 + $0x58] sm:$0xff] }
 0x16f   :  { %v3312_v23 = vpack.c.bf16 %v1564_v22, %v1563_v20 }
 0x171   :  { %3031 = vmatpush3.bf16.msra.mxu0 %v3028_v55 }
 0x172   :  { %3033 = vmatprep.subr.bf16.mxu0 %v3032_v58 }
 0x175   :  { %3035 = vmatpush3.bf16.msra.mxu0 %v3032_v58  ;;  %v1553_v58 = vld [vmem:[#allocation7] sm:$0xff] }
 0x176   :  { %3037 = vmatprep.subr.bf16.mxu0 %v3036_v61  ;;  %v3292_v60 = vpack.c.bf16 %v1554_v59, %v1553_v58  ;;  %v2053_v58 = vld [vmem:[%s4367_s6 + $0x88] sm:$0xff]  ;;  %v2054_v59 = vld [vmem:[%s4367_s6 + $0x90] sm:$0xff] }
 0x179   :  { %3039 = vmatpush3.bf16.msra.mxu0 %v3036_v61 }
 0x17a   :  { %3041 = vmatprep.subr.bf16.mxu0 %v3040_v0 }
 0x17d   :  { %3043 = vmatpush3.bf16.msra.mxu0 %v3040_v0 }
 0x17e   :  { %3045 = vmatprep.subr.bf16.mxu0 %v3044_v5 }
 0x181   :  { %3047 = vmatpush3.bf16.msra.mxu0 %v3044_v5 }
 0x182   :  { %3049 = vmatprep.subr.bf16.mxu0 %v3048_v9 }
 0x185   :  { %3051 = vmatpush3.bf16.msra.mxu0 %v3048_v9  ;;  %v1557_v9 = vld [vmem:[#allocation7 + $0x20] sm:$0xff] }
 0x186   :  { %3053 = vmatprep.subr.bf16.mxu0 %v3052_v1 }
 0x189   :  { %3055 = vmatpush3.bf16.msra.mxu0 %v3052_v1  ;;  %v1560_v1 = vld [vmem:[#allocation7 + $0x38] sm:$0xff] }
 0x18a   :  { %3153 = vmatprep.subr.bf16.mxu0 %v4033_v21  ;;  %v3304_v13 = vpack.c.bf16 %v1560_v1, %v1559_v12  ;;  %v2066_v1 = vld [vmem:[%s4367_s6 + $0xf0] sm:$0xff] }
 0x18c   :  { %2505 = vmatmul.mubr.f32.vlgmr.msra.gmra.mrb[0].mxu0 %v3946_v32  ;;  %v133_v32 = vld [vmem:[#allocation10 + $0x48] sm:$0xff] }
 0x18d   :  { %3155 = vmatpush3.bf16.msra.mxu0 %v4033_v21  ;;  %v4049_v33 = vpack.c.bf16 %v133_v32, %v132_v31  ;;  %v1568_v31 = vld [vmem:[#allocation7 + $0x78] sm:$0xff] }
 0x18e   :  { %3157 = vmatprep.subr.bf16.mxu0 %v4036_v24  ;;  %v3320_v32 = vpack.c.bf16 %v1568_v31, %v1567_v29  ;;  %v3228_v31 = vpack.c.bf16 %v1110_v26, %v1109_v25  ;;  %v1541_v26 = vld [vmem:[#allocation6 + $0x20] sm:$0xff] }
 0x191   :  { %3159 = vmatpush3.bf16.msra.mxu0 %v4036_v24 }
 0x192   :  { %3161 = vmatprep.subr.bf16.mxu0 %v4041_v27 }
 0x195   :  { %3163 = vmatpush3.bf16.msra.mxu0 %v4041_v27 }
 0x196   :  { %3165 = vmatprep.subr.bf16.mxu0 %v4045_v30 }
 0x199   :  { %3167 = vmatpush3.bf16.msra.mxu0 %v4045_v30 }
 0x19a   :  { %3169 = vmatprep.subr.bf16.mxu0 %v4049_v33 }
 0x19d   :  { %3171 = vmatpush3.bf16.msra.mxu0 %v4049_v33 }
 0x19e   :  { %3173 = vmatprep.subr.bf16.mxu0 %v4053_v37 }
 0x1a1   :  { %3175 = vmatpush3.bf16.msra.mxu0 %v4053_v37 }
 0x1a2   :  { %3177 = vmatprep.subr.bf16.mxu0 %v4057_v39 }
 0x1a5   :  { %3179 = vmatpush3.bf16.msra.mxu0 %v4057_v39 }
 0x1a6   :  { %3181 = vmatprep.subr.bf16.mxu0 %v4075_v46 }
 0x1a9   :  { %3183 = vmatpush3.bf16.msra.mxu0 %v4075_v46 }
 0x1aa   :  { %3293 = vmatprep.subr.bf16.mxu0 %v3292_v60 }
 0x25f   :  { %v2506_v40 = vpop.f32.mrb[0].mxu0 }
 0x260   :  { %v658_v41 = vpop.f32.mrb[1].mxu0  ;;  %v670_v43 = vmax.f32 %v2506_v40, 0.0  ;;  %v1020_v40 = vsub.s32 1, %v4081_v48 }
 0x261   :  { %v669_v42 = vmax.f32 %v658_v41, 0.0 }
 0x262   :  { %v1021_v41 = vrot.slane %v4084_v50, %v1020_v40 }
 0x263   :  { %2574 = vmatprep.mubr.f32.mxu1 %v669_v42  ;;  %v1028_v42 = vsub.s32 2, %v4081_v48 }
 0x264   :  { %2575 = vmatmul.mubr.f32.vlgmr.msra.gmra.mrb[6].mxu1 %v670_v43 }
 0x265   :  { %3123 = vmatpush3.bf16.msra.mxu1 %v4033_v21  ;;  %v1029_v47 = vrot.slane %v4084_v50, %v1028_v42 }
 0x266   :  { %3125 = vmatprep.subr.bf16.mxu1 %v4036_v24 }
 0x269   :  { %3127 = vmatpush3.bf16.msra.mxu1 %v4036_v24 }
 0x26a   :  { %3129 = vmatprep.subr.bf16.mxu1 %v4041_v27 }
 0x26d   :  { %3131 = vmatpush3.bf16.msra.mxu1 %v4041_v27 }
 0x26e   :  { %3133 = vmatprep.subr.bf16.mxu1 %v4045_v30 }
 0x271   :  { %3135 = vmatpush3.bf16.msra.mxu1 %v4045_v30 }
 0x272   :  { %3137 = vmatprep.subr.bf16.mxu1 %v4049_v33 }
 0x275   :  { %3139 = vmatpush3.bf16.msra.mxu1 %v4049_v33 }
 0x276   :  { %3141 = vmatprep.subr.bf16.mxu1 %v4053_v37 }
 0x279   :  { %3143 = vmatpush3.bf16.msra.mxu1 %v4053_v37 }
 0x27a   :  { %3145 = vmatprep.subr.bf16.mxu1 %v4057_v39 }
 0x27d   :  { %3147 = vmatpush3.bf16.msra.mxu1 %v4057_v39 }
 0x27e   :  { %3149 = vmatprep.subr.bf16.mxu1 %v4075_v46 }
 0x281   :  { %3151 = vmatpush3.bf16.msra.mxu1 %v4075_v46 }
 0x337   :  { %v2576_v52 = vpop.f32.mrb[6].mxu1 }
 0x338   :  { %v859_v53 = vadd.f32 %v2576_v52, %v857_v51  ;;  %v845_v54 = vpop.f32.mrb[7].mxu1 }
 0x339   :  { %v858_v55 = vadd.f32 %v857_v51, %v845_v54 }
 0x33a   :  { %v861_v57 = vmax.f32 %v859_v53, 0.0 }
 0x33b   :  { %v860_v56 = vmax.f32 %v858_v55, 0.0 }
 0x33d   :  { %2609 = vmatprep.mubr.f32.mxu1 %v860_v56 }
 0x33e   :  { %2610 = vmatmul.mubr.f32.vlgmr.msra.gmra.mrb[8].mxu1 %v861_v57 }
 0x33f   :  { %2651 = vmatprep.mubr.msk.f32.mxu1 %vm148_vm0, %v3793_v2  ;;  %v3300_v2 = vpack.c.bf16 %v1558_v11, %v1557_v9  ;;  %v2064_v11 = vld [vmem:[%s4367_s6 + $0xe0] sm:$0xff] }
 0x411   :  { %v2611_v61 = vpop.f32.mrb[8].mxu1 }
 0x412   :  { %v938_v62 = vsub.f32 %v861_v57, %v2611_v61  ;;  %v928_v63 = vpop.f32.mrb[9].mxu1  ;;  %v2052_v57 = vld [vmem:[%s4367_s6 + $0x80] sm:$0xff] }
 0x413   :  { %v937_v0 = vsub.f32 %v860_v56, %v928_v63  ;;  %v3192_v50 = vpack.c.bf16 %v2053_v58, %v2052_v57  ;;  %v2057_v63 = vld [vmem:[%s4367_s6 + $0xa8] sm:$0xff]  ;;  %v1121_v57 = vld [vmem:[%s4367_s6 + $0x70] sm:$0xff]  ;;  %v1122_v58 = vld [vmem:[%s4367_s6 + $0x78] sm:$0xff] }
 0x414   :  { %v940_v6 = vmul.f32 %v938_v62, %v938_v62 }
 0x415   :  { %v939_v5 = vmul.f32 %v937_v0, %v937_v0 }
 0x417   :  { %2644 = vmatprep.mubr.f32.mxu0 %v939_v5 }
 0x418   :  { %2645 = vmatmul.mubr.f32.vlgmr.msra.gmra.mrb[2].mxu0 %v940_v6  ;;  %v2062_v6 = vld [vmem:[%s4367_s6 + $0xd0] sm:$0xff] }
 0x419   :  { %3295 = vmatpush3.bf16.msra.mxu0 %v3292_v60  ;;  %v2055_v60 = vld [vmem:[%s4367_s6 + $0x98] sm:$0xff] }
 0x41a   :  { %3297 = vmatprep.subr.bf16.mxu0 %v3296_v7  ;;  %v3196_v61 = vpack.c.bf16 %v2055_v60, %v2054_v59  ;;  %v2070_v59 = vld [vmem:[%s4367_s6 + $0x100] sm:$0xff]  ;;  %v2071_v60 = vld [vmem:[%s4367_s6 + $0x108] sm:$0xff] }
 0x41d   :  { %3299 = vmatpush3.bf16.msra.mxu0 %v3296_v7  ;;  %v2063_v7 = vld [vmem:[%s4367_s6 + $0xd8] sm:$0xff] }
 0x41e   :  { %3301 = vmatprep.subr.bf16.mxu0 %v3300_v2  ;;  %v3212_v9 = vpack.c.bf16 %v2063_v7, %v2062_v6  ;;  %v2080_v6 = vld [vmem:[%s4367_s6 + $0x150] sm:$0xff]  ;;  %v2081_v7 = vld [vmem:[%s4367_s6 + $0x158] sm:$0xff] }
 0x421   :  { %3303 = vmatpush3.bf16.msra.mxu0 %v3300_v2  ;;  %v2065_v2 = vld [vmem:[%s4367_s6 + $0xe8] sm:$0xff] }
 0x422   :  { %3305 = vmatprep.subr.bf16.mxu0 %v3304_v13  ;;  %v3216_v12 = vpack.c.bf16 %v2065_v2, %v2064_v11  ;;  %v2082_v11 = vld [vmem:[%s4367_s6 + $0x160] sm:$0xff]  ;;  %v2083_v2 = vld [vmem:[%s4367_s6 + $0x168] sm:$0xff] }
 0x425   :  { %3307 = vmatpush3.bf16.msra.mxu0 %v3304_v13  ;;  %v2067_v13 = vld [vmem:[%s4367_s6 + $0xf8] sm:$0xff] }
 0x426   :  { %3309 = vmatprep.subr.bf16.mxu0 %v3308_v18  ;;  %v3220_v16 = vpack.c.bf16 %v2067_v13, %v2066_v1  ;;  %v2084_v1 = vld [vmem:[%s4367_s6 + $0x170] sm:$0xff]  ;;  %v2085_v13 = vld [vmem:[%s4367_s6 + $0x178] sm:$0xff] }
 0x429   :  { %3311 = vmatpush3.bf16.msra.mxu0 %v3308_v18  ;;  %v1108_v18 = vld [vmem:[%s4367_s6 + $0x8] sm:$0xff] }
 0x42a   :  { %3313 = vmatprep.subr.bf16.mxu0 %v3312_v23  ;;  %v3224_v20 = vpack.c.bf16 %v1108_v18, %v1107_v17  ;;  %v1537_v17 = vld [vmem:[#allocation6] sm:$0xff]  ;;  %v1538_v18 = vld [vmem:[#allocation6 + $0x8] sm:$0xff] }
 0x42d   :  { %3315 = vmatpush3.bf16.msra.mxu0 %v3312_v23 }
 0x42e   :  { %3317 = vmatprep.subr.bf16.mxu0 %v3316_v28 }
 0x431   :  { %3319 = vmatpush3.bf16.msra.mxu0 %v3316_v28 }
 0x432   :  { %3321 = vmatprep.subr.bf16.mxu0 %v3320_v32 }
 0x435   :  { %3323 = vmatpush3.bf16.msra.mxu0 %v3320_v32  ;;  %v1111_v32 = vld [vmem:[%s4367_s6 + $0x20] sm:$0xff] }
 0x4eb   :  { %v2646_v34 = vpop.f32.mrb[2].mxu0 }
 0x4ec   :  { %v1013_v36 = vadd.f32 1e-05, %v2646_v34  ;;  %v1007_v38 = vpop.f32.mrb[3].mxu0  ;;  %v1112_v34 = vld [vmem:[%s4367_s6 + $0x28] sm:$0xff] }
 0x4ed   :  { %v1008_v35 = vadd.f32 1e-05, %v1007_v38  ;;  %v1113_v38 = vld [vmem:[%s4367_s6 + $0x30] sm:$0xff] }
 0x4ee   :  { %3472 = vrsqrt.f32 %v1013_v36  ;;  %v3232_v36 = vpack.c.bf16 %v1112_v34, %v1111_v32  ;;  %v1544_v32 = vld [vmem:[#allocation6 + $0x38] sm:$0xff] }
 0x4ef   :  { %3474 = vrsqrt.f32 %v1008_v35  ;;  %v1114_v35 = vld [vmem:[%s4367_s6 + $0x38] sm:$0xff] }
 0x4f8   :  { %v3473_v43 = vpop.eup %3472 }
 0x4f9   :  { %v3475_v44 = vpop.eup %3474  ;;  %v1023_v45 = vmul.f32 %v3473_v43, %v1021_v41  ;;  %v1115_v43 = vld [vmem:[%s4367_s6 + $0x40] sm:$0xff] }
 0x4fa   :  { %v1022_v51 = vmul.f32 %v3475_v44, %v1021_v41  ;;  %v3236_v41 = vpack.c.bf16 %v1114_v35, %v1113_v38  ;;  %v1116_v44 = vld [vmem:[%s4367_s6 + $0x48] sm:$0xff] }
 0x4fb   :  { %v1025_v52 = vmul.f32 %v1023_v45, %v938_v62  ;;  %v2056_v62 = vld [vmem:[%s4367_s6 + $0xa0] sm:$0xff]  ;;  %v3240_v45 = vpack.c.bf16 %v1116_v44, %v1115_v43  ;;  %v1546_v38 = vld [vmem:[#allocation6 + $0x48] sm:$0xff] }
 0x4fc   :  { %v1024_v53 = vmul.f32 %v1022_v51, %v937_v0  ;;  %v2059_v0 = vld [vmem:[%s4367_s6 + $0xb8] sm:$0xff] }
 0x4fd   :  { %v1031_v54 = vadd.f32 %v1029_v47, %v1025_v52  ;;  %v1118_v51 = vld [vmem:[%s4367_s6 + $0x58] sm:$0xff] }
 0x4fe   :  { %v1030_v55 = vadd.f32 %v1029_v47, %v1024_v53  ;;  %v1117_v47 = vld [vmem:[%s4367_s6 + $0x50] sm:$0xff]  ;;  %v1119_v53 = vld [vmem:[%s4367_s6 + $0x60] sm:$0xff] }
 0x4ff   :  { %v3244_v52 = vpack.c.bf16 %v1118_v51, %v1117_v47  ;;  %v1548_v43 = vld [vmem:[#allocation6 + $0x58] sm:$0xff]  ;;  %v1550_v47 = vld [vmem:[#allocation6 + $0x68] sm:$0xff] }
 0x500   :  { %v4099_v56 = vpack.c.bf16 %v1031_v54, %v1030_v55  ;;  %2805 = vmatprep.mubr.f32.mxu0 %v1030_v55 }
 0x501   :  { %2806 = vmatmul.mubr.f32.vlgmr.msra.gmra.mrb[4].mxu0 %v1031_v54  ;;  %v1120_v54 = vld [vmem:[%s4367_s6 + $0x68] sm:$0xff] }
 0x502   :  { %3185 = vmatprep.subr.bf16.mxu1 %v4099_v56  ;;  %v3248_v55 = vpack.c.bf16 %v1120_v54, %v1119_v53  ;;  %v1551_v54 = vld [vmem:[#allocation6 + $0x70] sm:$0xff] }
 0x503   :  { %3187 = vmatpush3.bf16.msra.mxu1 %v4099_v56 }
 0x504   :  { %3189 = vmatprep.subr.bf16.mxu1 %v4099_v56 }
 0x506   :  { %2652 = vmatmul.mubr.msk.f32.vlgmr.msra.gmra.mrb[10].mxu1 %vm148_vm0, %v3813_v8  ;;  %v3200_v8 = vpack.c.bf16 %v2057_v63, %v2056_v62  ;;  %v2072_v62 = vld [vmem:[%s4367_s6 + $0x110] sm:$0xff]  ;;  %v2073_v63 = vld [vmem:[%s4367_s6 + $0x118] sm:$0xff] }
 0x507   :  { %3191 = vmatpush3.bf16.msra.mxu1 %v4099_v56  ;;  %2658 = vmatprep.mubr.msk.f32.mxu1 %vm148_vm0, %v3818_v10  ;;  %v2058_v10 = vld [vmem:[%s4367_s6 + $0xb0] sm:$0xff] }
 0x508   :  { %3193 = vmatprep.subr.bf16.mxu1 %v3192_v50  ;;  %v3204_v3 = vpack.c.bf16 %v2059_v0, %v2058_v10  ;;  %v2074_v10 = vld [vmem:[%s4367_s6 + $0x120] sm:$0xff]  ;;  %v2075_v0 = vld [vmem:[%s4367_s6 + $0x128] sm:$0xff] }
 0x50a   :  { %2659 = vmatmul.mubr.msk.f32.vlgmr.msra.gmra.mrb[12].mxu1 %vm148_vm0, %v3833_v14  ;;  %v2061_v14 = vld [vmem:[%s4367_s6 + $0xc8] sm:$0xff] }
 0x50b   :  { %3195 = vmatpush3.bf16.msra.mxu1 %v3192_v50  ;;  %v3208_v5 = vpack.c.bf16 %v2061_v14, %v2060_v4  ;;  %v3252_v50 = vpack.c.bf16 %v1122_v58, %v1121_v57  ;;  %v2078_v14 = vld [vmem:[%s4367_s6 + $0x140] sm:$0xff] }
 0x50c   :  { %3197 = vmatprep.subr.bf16.mxu1 %v3196_v61 }
 0x50f   :  { %3199 = vmatpush3.bf16.msra.mxu1 %v3196_v61  ;;  %v3260_v61 = vpack.c.bf16 %v2071_v60, %v2070_v59 }
 0x510   :  { %3201 = vmatprep.subr.bf16.mxu1 %v3200_v8 }
 0x513   :  { %3203 = vmatpush3.bf16.msra.mxu1 %v3200_v8  ;;  %v3264_v8 = vpack.c.bf16 %v2073_v63, %v2072_v62 }
 0x514   :  { %3205 = vmatprep.subr.bf16.mxu1 %v3204_v3 }
 0x517   :  { %3207 = vmatpush3.bf16.msra.mxu1 %v3204_v3  ;;  %v3268_v3 = vpack.c.bf16 %v2075_v0, %v2074_v10  ;;  %v1901_v0 = vld [vmem:[%s4372_s11 + $0x20] sm:$0xff] }
 0x518   :  { %3209 = vmatprep.subr.bf16.mxu1 %v3208_v5 }
 0x51b   :  { %3211 = vmatpush3.bf16.msra.mxu1 %v3208_v5 }
 0x51c   :  { %3213 = vmatprep.subr.bf16.mxu1 %v3212_v9 }
 0x51f   :  { %3215 = vmatpush3.bf16.msra.mxu1 %v3212_v9  ;;  %v3280_v9 = vpack.c.bf16 %v2081_v7, %v2080_v6  ;;  %v1903_v7 = vld [vmem:[%s4372_s11 + $0x30] sm:$0xff] }
 0x520   :  { %3217 = vmatprep.subr.bf16.mxu1 %v3216_v12 }
 0x523   :  { %3219 = vmatpush3.bf16.msra.mxu1 %v3216_v12  ;;  %v3284_v12 = vpack.c.bf16 %v2083_v2, %v2082_v11  ;;  %v1905_v2 = vld [vmem:[%s4372_s11 + $0x40] sm:$0xff] }
 0x524   :  { %3221 = vmatprep.subr.bf16.mxu1 %v3220_v16 }
 0x527   :  { %3223 = vmatpush3.bf16.msra.mxu1 %v3220_v16  ;;  %v3288_v16 = vpack.c.bf16 %v2085_v13, %v2084_v1  ;;  %v1907_v13 = vld [vmem:[%s4372_s11 + $0x50] sm:$0xff] }
 0x528   :  { %3225 = vmatprep.subr.bf16.mxu1 %v3224_v20 }
 0x5d9   :  { %v2653_v22 = vpop.f32.mrb[10].mxu1 }
 0x5da   :  { %v1098_v23 = vpop.f32.mrb[11].mxu1 }
 0x5dd   :  { %v2660_v28 = vpop.f32.mrb[12].mxu1 }
 0x5de   :  { %v1189_v29 = vpop.f32.mrb[13].mxu1 }
 0x5df   :  { %2693 = vmatprep.mubr.f32.mxu1 %v1189_v29 }
 0x5e0   :  { %2694 = vmatmul.mubr.f32.vlgmr.msra.gmra.mrb[14].mxu1 %v2660_v28  ;;  %v1542_v28 = vld [vmem:[#allocation6 + $0x28] sm:$0xff] }
 0x5e1   :  { %3227 = vmatpush3.bf16.msra.mxu1 %v3224_v20  ;;  %2728 = vmatprep.mubr.f32.mxu1 %v1098_v23  ;;  %v1539_v20 = vld [vmem:[#allocation6 + $0x10] sm:$0xff]  ;;  %v1540_v23 = vld [vmem:[#allocation6 + $0x18] sm:$0xff]  ;;  %v3332_v29 = vpack.c.bf16 %v1542_v28, %v1541_v26 }
 0x5e2   :  { %3229 = vmatprep.subr.bf16.mxu1 %v3228_v31  ;;  %v3328_v25 = vpack.c.bf16 %v1540_v23, %v1539_v20  ;;  %v1910_v20 = vld [vmem:[%s4372_s11 + $0x68] sm:$0xff]  ;;  %v1911_v23 = vld [vmem:[%s4372_s11 + $0x70] sm:$0xff] }
 0x5e5   :  { %3231 = vmatpush3.bf16.msra.mxu1 %v3228_v31  ;;  %v1543_v31 = vld [vmem:[#allocation6 + $0x30] sm:$0xff] }
 0x5e6   :  { %3233 = vmatprep.subr.bf16.mxu1 %v3232_v36  ;;  %v3336_v34 = vpack.c.bf16 %v1544_v32, %v1543_v31 }
 0x5e9   :  { %3235 = vmatpush3.bf16.msra.mxu1 %v3232_v36  ;;  %v1545_v36 = vld [vmem:[#allocation6 + $0x40] sm:$0xff] }
 0x5ea   :  { %3237 = vmatprep.subr.bf16.mxu1 %v3236_v41  ;;  %v3340_v35 = vpack.c.bf16 %v1546_v38, %v1545_v36 }
 0x5ed   :  { %3239 = vmatpush3.bf16.msra.mxu1 %v3236_v41  ;;  %v1547_v41 = vld [vmem:[#allocation6 + $0x50] sm:$0xff] }
 0x5ee   :  { %3241 = vmatprep.subr.bf16.mxu1 %v3240_v45  ;;  %v3344_v44 = vpack.c.bf16 %v1548_v43, %v1547_v41 }
 0x5f1   :  { %3243 = vmatpush3.bf16.msra.mxu1 %v3240_v45  ;;  %v1549_v45 = vld [vmem:[#allocation6 + $0x60] sm:$0xff] }
 0x5f2   :  { %3245 = vmatprep.subr.bf16.mxu1 %v3244_v52  ;;  %v3348_v51 = vpack.c.bf16 %v1550_v47, %v1549_v45 }
 0x5f5   :  { %3247 = vmatpush3.bf16.msra.mxu1 %v3244_v52 }
 0x5f6   :  { %3249 = vmatprep.subr.bf16.mxu1 %v3248_v55 }
 0x5f9   :  { %3251 = vmatpush3.bf16.msra.mxu1 %v3248_v55  ;;  %v1552_v55 = vld [vmem:[#allocation6 + $0x78] sm:$0xff] }
 0x5fa   :  { %3253 = vmatprep.subr.bf16.mxu1 %v3252_v50  ;;  %v3352_v57 = vpack.c.bf16 %v1552_v55, %v1551_v54 }
 0x5fd   :  { %3255 = vmatpush3.bf16.msra.mxu1 %v3252_v50 }
 0x5fe   :  { %3257 = vmatprep.subr.bf16.mxu1 %v4099_v56 }
 0x600   :  { %2729 = vmatmul.mubr.f32.vlgmr.msra.gmra.mrb[14].mxu1 %v2653_v22  ;;  %v3324_v22 = vpack.c.bf16 %v1538_v18, %v1537_v17  ;;  %v1909_v18 = vld [vmem:[%s4372_s11 + $0x60] sm:$0xff] }
 0x601   :  { %3259 = vmatpush3.bf16.msra.mxu1 %v4099_v56  ;;  %2735 = vmatprep.mubr.msk.f32.mxu1 %vm148_vm0, %v3838_v15  ;;  %v2076_v15 = vld [vmem:[%s4367_s6 + $0x130] sm:$0xff]  ;;  %v2077_v56 = vld [vmem:[%s4367_s6 + $0x138] sm:$0xff] }
 0x602   :  { %3261 = vmatprep.subr.bf16.mxu1 %v3260_v61  ;;  %v3272_v4 = vpack.c.bf16 %v2077_v56, %v2076_v15  ;;  %3325 = vmatprep.subr.bf16.mxu0 %v3324_v22 }
 0x603   :  { %3327 = vmatpush3.bf16.msra.mxu0 %v3324_v22  ;;  %v3444_v22 = vpack.c.bf16 %v1910_v20, %v1909_v18 }
 0x604   :  { %2736 = vmatmul.mubr.msk.f32.vlgmr.msra.gmra.mrb[16].mxu1 %vm148_vm0, %v3853_v19  ;;  %v2079_v19 = vld [vmem:[%s4367_s6 + $0x148] sm:$0xff]  ;;  %3329 = vmatprep.subr.bf16.mxu0 %v3328_v25 }
 0x605   :  { %3263 = vmatpush3.bf16.msra.mxu1 %v3260_v61  ;;  %v3276_v5 = vpack.c.bf16 %v2079_v19, %v2078_v14 }
 0x606   :  { %3265 = vmatprep.subr.bf16.mxu1 %v3264_v8 }
 0x607   :  { %3331 = vmatpush3.bf16.msra.mxu0 %v3328_v25  ;;  %v1912_v25 = vld [vmem:[%s4372_s11 + $0x78] sm:$0xff] }
 0x608   :  { %3333 = vmatprep.subr.bf16.mxu0 %v3332_v29  ;;  %v3448_v26 = vpack.c.bf16 %v1912_v25, %v1911_v23 }
 0x609   :  { %3267 = vmatpush3.bf16.msra.mxu1 %v3264_v8  ;;  %v1900_v8 = vld [vmem:[%s4372_s11 + $0x18] sm:$0xff] }
 0x60a   :  { %3269 = vmatprep.subr.bf16.mxu1 %v3268_v3 }
 0x60b   :  { %3335 = vmatpush3.bf16.msra.mxu0 %v3332_v29 }
 0x60c   :  { %3337 = vmatprep.subr.bf16.mxu0 %v3336_v34 }
 0x60d   :  { %3271 = vmatpush3.bf16.msra.mxu1 %v3268_v3  ;;  %v1902_v3 = vld [vmem:[%s4372_s11 + $0x28] sm:$0xff] }
 0x60e   :  { %3273 = vmatprep.subr.bf16.mxu1 %v3272_v4  ;;  %v3428_v15 = vpack.c.bf16 %v1902_v3, %v1901_v0 }
 0x60f   :  { %3339 = vmatpush3.bf16.msra.mxu0 %v3336_v34 }
 0x610   :  { %3341 = vmatprep.subr.bf16.mxu0 %v3340_v35 }
 0x611   :  { %3275 = vmatpush3.bf16.msra.mxu1 %v3272_v4 }
 0x612   :  { %3277 = vmatprep.subr.bf16.mxu1 %v3276_v5 }
 0x613   :  { %3343 = vmatpush3.bf16.msra.mxu0 %v3340_v35 }
 0x614   :  { %3345 = vmatprep.subr.bf16.mxu0 %v3344_v44 }
 0x615   :  { %3279 = vmatpush3.bf16.msra.mxu1 %v3276_v5 }
 0x616   :  { %3281 = vmatprep.subr.bf16.mxu1 %v3280_v9 }
 0x617   :  { %3347 = vmatpush3.bf16.msra.mxu0 %v3344_v44 }
 0x618   :  { %3349 = vmatprep.subr.bf16.mxu0 %v3348_v51 }
 0x619   :  { %3283 = vmatpush3.bf16.msra.mxu1 %v3280_v9  ;;  %v1904_v9 = vld [vmem:[%s4372_s11 + $0x38] sm:$0xff] }
 0x61a   :  { %3285 = vmatprep.subr.bf16.mxu1 %v3284_v12  ;;  %v3432_v11 = vpack.c.bf16 %v1904_v9, %v1903_v7 }
 0x61b   :  { %3351 = vmatpush3.bf16.msra.mxu0 %v3348_v51 }
 0x61c   :  { %3353 = vmatprep.subr.bf16.mxu0 %v3352_v57 }
 0x61d   :  { %3287 = vmatpush3.bf16.msra.mxu1 %v3284_v12  ;;  %v1906_v12 = vld [vmem:[%s4372_s11 + $0x48] sm:$0xff] }
 0x61e   :  { %3289 = vmatprep.subr.bf16.mxu1 %v3288_v16  ;;  %v3436_v1 = vpack.c.bf16 %v1906_v12, %v1905_v2 }
 0x61f   :  { %3355 = vmatpush3.bf16.msra.mxu0 %v3352_v57 }
 0x620   :  { %3357 = vmatprep.subr.bf16.mxu0 %v4033_v21 }
 0x621   :  { %3291 = vmatpush3.bf16.msra.mxu1 %v3288_v16  ;;  %v1908_v16 = vld [vmem:[%s4372_s11 + $0x58] sm:$0xff] }
 0x622   :  { %3389 = vmatprep.subr.bf16.mxu1 %v4033_v21  ;;  %v3440_v17 = vpack.c.bf16 %v1908_v16, %v1907_v13 }
 0x6d7   :  { %v2737_v52 = vpop.f32.mrb[16].mxu1 }
 0x6d8   :  { %v1431_v53 = vpop.f32.mrb[17].mxu1 }
 0x6d9   :  { %2770 = vmatprep.mubr.f32.mxu1 %v1431_v53 }
 0x6da   :  { %2771 = vmatmul.mubr.f32.vlgmr.msra.gmra.mrb[14].mxu1 %v2737_v52  ;;  %v2086_v52 = vld [vmem:[%s4373_s12] ss:$0 sm:$0xff] }
 0x6db   :  { %3391 = vmatpush3.bf16.msra.mxu1 %v4033_v21 }
 0x6dc   :  { %3393 = vmatprep.subr.bf16.mxu1 %v4036_v24 }
 0x6df   :  { %3395 = vmatpush3.bf16.msra.mxu1 %v4036_v24 }
 0x6e0   :  { %3397 = vmatprep.subr.bf16.mxu1 %v4041_v27 }
 0x6e3   :  { %3399 = vmatpush3.bf16.msra.mxu1 %v4041_v27 }
 0x6e4   :  { %3401 = vmatprep.subr.bf16.mxu1 %v4045_v30 }
 0x6e7   :  { %3403 = vmatpush3.bf16.msra.mxu1 %v4045_v30 }
 0x6e8   :  { %3405 = vmatprep.subr.bf16.mxu1 %v4049_v33 }
 0x6eb   :  { %3407 = vmatpush3.bf16.msra.mxu1 %v4049_v33 }
 0x6ec   :  { %3409 = vmatprep.subr.bf16.mxu1 %v4053_v37 }
 0x6ef   :  { %3411 = vmatpush3.bf16.msra.mxu1 %v4053_v37 }
 0x6f0   :  { %3413 = vmatprep.subr.bf16.mxu1 %v4057_v39 }
 0x6f3   :  { %3415 = vmatpush3.bf16.msra.mxu1 %v4057_v39 }
 0x6f4   :  { %3417 = vmatprep.subr.bf16.mxu1 %v4075_v46 }
 0x6f7   :  { %3419 = vmatpush3.bf16.msra.mxu1 %v4075_v46 }
 0x7ad   :  { %v2772_v58 = vpop.f32.mrb[14].mxu1 }
 0x7ae   :  { %v1523_v50 = vpop.f32.mrb[15].mxu1  ;;  %v1535_v60 = vmax.f32 %v2772_v58, 0.0 }
 0x7af   :  { %v1534_v59 = vmax.f32 %v1523_v50, 0.0 }
 0x7b1   :  { %2840 = vmatprep.mubr.f32.mxu0 %v1534_v59 }
 0x7b2   :  { %2841 = vmatmul.mubr.f32.vlgmr.msra.gmra.mrb[4].mxu0 %v1535_v60 }
 0x7b3   :  { %3359 = vmatpush3.bf16.msra.mxu0 %v4033_v21  ;;  %v4293_v21 = vld [vmem:[#allocation9] sm:$0x7] }
 0x7b4   :  { %3361 = vmatprep.subr.bf16.mxu0 %v4036_v24  ;;  %v1886_v34 = vrot.slane %v4293_v21, %v1020_v40  ;;  %v1894_v43 = vrot.slane %v4293_v21, %v1028_v42 }
 0x7b7   :  { %3363 = vmatpush3.bf16.msra.mxu0 %v4036_v24  ;;  %v1722_v24 = vrot.slane %v4293_v21, %v856_v49  ;;  %v1899_v49 = vld [vmem:[%s4372_s11 + $0x10] sm:$0xff] }
 0x7b8   :  { %3365 = vmatprep.subr.bf16.mxu0 %v4041_v27  ;;  %v3424_v10 = vpack.c.bf16 %v1900_v8, %v1899_v49 }
 0x7bb   :  { %3367 = vmatpush3.bf16.msra.mxu0 %v4041_v27 }
 0x7bc   :  { %3369 = vmatprep.subr.bf16.mxu0 %v4045_v30 }
 0x7bf   :  { %3371 = vmatpush3.bf16.msra.mxu0 %v4045_v30 }
 0x7c0   :  { %3373 = vmatprep.subr.bf16.mxu0 %v4049_v33 }
 0x7c3   :  { %3375 = vmatpush3.bf16.msra.mxu0 %v4049_v33 }
 0x7c4   :  { %3377 = vmatprep.subr.bf16.mxu0 %v4053_v37 }
 0x7c7   :  { %3379 = vmatpush3.bf16.msra.mxu0 %v4053_v37 }
 0x7c8   :  { %3381 = vmatprep.subr.bf16.mxu0 %v4057_v39 }
 0x7cb   :  { %3383 = vmatpush3.bf16.msra.mxu0 %v4057_v39  ;;  %v1897_v39 = vld [vmem:[%s4372_s11] sm:$0xff] }
 0x7cc   :  { %3385 = vmatprep.subr.bf16.mxu0 %v4075_v46 }
 0x7cf   :  { %3387 = vmatpush3.bf16.msra.mxu0 %v4075_v46  ;;  %v1898_v46 = vld [vmem:[%s4372_s11 + $0x8] sm:$0xff] }
 0x7d0   :  { %v3420_v63 = vpack.c.bf16 %v1898_v46, %v1897_v39 }
 0x7d2   :  { %3421 = vmatprep.subr.bf16.mxu0 %v3420_v63 }
 0x885   :  { %v2842_v27 = vpop.f32.mrb[4].mxu0 }
 0x886   :  { %v1724_v30 = vadd.f32 %v2842_v27, %v1722_v24  ;;  %v1710_v33 = vpop.f32.mrb[5].mxu0 }
 0x887   :  { %v1723_v61 = vadd.f32 %v1722_v24, %v1710_v33 }
 0x888   :  { %v1726_v37 = vmax.f32 %v1724_v30, 0.0 }
 0x889   :  { %v1725_v62 = vmax.f32 %v1723_v61, 0.0 }
 0x88b   :  { %2875 = vmatprep.mubr.f32.mxu0 %v1725_v62 }
 0x88c   :  { %2876 = vmatmul.mubr.f32.vlgmr.msra.gmra.mrb[6].mxu0 %v1726_v37 }
 0x88d   :  { %3423 = vmatpush3.bf16.msra.mxu0 %v3420_v63 }
 0x88e   :  { %3425 = vmatprep.subr.bf16.mxu0 %v3424_v10 }
 0x891   :  { %3427 = vmatpush3.bf16.msra.mxu0 %v3424_v10 }
 0x892   :  { %3429 = vmatprep.subr.bf16.mxu0 %v3428_v15 }
 0x895   :  { %3431 = vmatpush3.bf16.msra.mxu0 %v3428_v15 }
 0x896   :  { %3433 = vmatprep.subr.bf16.mxu0 %v3432_v11 }
 0x899   :  { %3435 = vmatpush3.bf16.msra.mxu0 %v3432_v11 }
 0x89a   :  { %3437 = vmatprep.subr.bf16.mxu0 %v3436_v1 }
 0x89d   :  { %3439 = vmatpush3.bf16.msra.mxu0 %v3436_v1 }
 0x89e   :  { %3441 = vmatprep.subr.bf16.mxu0 %v3440_v17 }
 0x8a1   :  { %3443 = vmatpush3.bf16.msra.mxu0 %v3440_v17 }
 0x8a2   :  { %3445 = vmatprep.subr.bf16.mxu0 %v3444_v22 }
 0x8a5   :  { %3447 = vmatpush3.bf16.msra.mxu0 %v3444_v22 }
 0x8a6   :  { %3449 = vmatprep.subr.bf16.mxu0 %v3448_v26 }
 0x8a9   :  { %3451 = vmatpush3.bf16.msra.mxu0 %v3448_v26 }
 0x95f   :  { %v2877_v56 = vpop.f32.mrb[6].mxu0 }
 0x960   :  { %v1803_v4 = vsub.f32 %v1726_v37, %v2877_v56  ;;  %v1793_v14 = vpop.f32.mrb[7].mxu0 }
 0x961   :  { %v1802_v19 = vsub.f32 %v1725_v62, %v1793_v14 }
 0x962   :  { %v1805_v6 = vmul.f32 %v1803_v4, %v1803_v4 }
 0x963   :  { %v1804_v5 = vmul.f32 %v1802_v19, %v1802_v19 }
 0x965   :  { %2910 = vmatprep.mubr.f32.mxu1 %v1804_v5 }
 0x966   :  { %2911 = vmatmul.mubr.f32.vlgmr.msra.gmra.mrb[18].mxu1 %v1805_v6 }
 0xa39   :  { %v2912_v28 = vpop.f32.mrb[18].mxu1 }
 0xa3a   :  { %v1878_v29 = vadd.f32 1e-05, %v2912_v28  ;;  %v1872_v31 = vpop.f32.mrb[19].mxu1 }
 0xa3b   :  { %v1873_v32 = vadd.f32 1e-05, %v1872_v31 }
 0xa3c   :  { %3476 = vrsqrt.f32 %v1878_v29 }
 0xa3d   :  { %3478 = vrsqrt.f32 %v1873_v32 }
 0xa46   :  { %v3477_v36 = vpop.eup %3476 }
 0xa47   :  { %v3479_v38 = vpop.eup %3478  ;;  %v1888_v35 = vmul.f32 %v3477_v36, %v1886_v34 }
 0xa48   :  { %v1887_v41 = vmul.f32 %v3479_v38, %v1886_v34 }
 0xa49   :  { %v1890_v44 = vmul.f32 %v1888_v35, %v1803_v4 }
 0xa4a   :  { %v1889_v45 = vmul.f32 %v1887_v41, %v1802_v19 }
 0xa4b   :  { %v1896_v51 = vadd.f32 %v1894_v43, %v1890_v44 }
 0xa4c   :  { %v1895_v47 = vadd.f32 %v1894_v43, %v1889_v45 }
 0xa4e   :  { %2945 = vmatprep.mubr.f32.mxu0 %v1895_v47 }
 0xa4f   :  { %2946 = vmatmul.mubr.f32.vlgmr.msra.gmra.mrb[8].mxu0 %v1896_v51 }
 0xb22   :  { %v2947_v53 = vpop.f32.mrb[8].mxu0 }
 0xb23   :  { %v1992_v40 = vadd.f32 %v2947_v53, %v2086_v52  ;;  %v1986_v54 = vpop.f32.mrb[9].mxu0 }
 0xb24   :  { %v1987_v55 = vadd.f32 %v2086_v52, %v1986_v54 }
 0xb25   :  { %1997 = vst.msk [vmem:[%s4374_s13 + $0x8] sm:$0xff] %vm1995_vm1, %v1992_v40 }
 0xb26   :  { %1996 = vst.msk [vmem:[%s4374_s13] sm:$0xff] %vm1995_vm1, %v1987_v55 }
 0xb27   :  { %2002 = vsyncpa [#allocation3], 1 }
 0xb28   :  { %2003 = vsyncpa [#allocation5], 1 }
 0xb29   :  { %2004 = vsyncpa [#allocation8], 1 }
 0xb2a   :  { %2005 = vsyncpa [#allocation11], 1 }

</bundles_post_ra>
